<compile_context>
chip_gen: v6e
topology: v6e:2x2x1
jax: 0.10.0
libtpu: 0.0.40
codegen_flags: <defaults>
</compile_context>

<pallas_src>
import math
import functools

import jax
import jax.numpy as jnp
from jax.experimental import pallas as pl
from jax.experimental.pallas import tpu as pltpu


# ----------------------------- config (small, lane-dense) -------------------
VOCAB_SIZE = 16
HIDDEN = 128                     # multiple of 128 -> lane-dense activations
NUM_HEADS = 4
DIM_K = HIDDEN // NUM_HEADS      # 32 (BERT convention: dim_k = hidden / heads)
NUM_LAYERS = 2
DIM_FF = HIDDEN * 4              # 512, lane-dense
BATCH = 2
SEQ = 8
LN_EPS = 1e-5


# ------------------------------ kernel helpers ------------------------------
def _layernorm(x, gamma, beta):
    mean = jnp.mean(x, axis=-1, keepdims=True)
    var = jnp.mean((x - mean) ** 2, axis=-1, keepdims=True)
    return (x - mean) * jax.lax.rsqrt(var + LN_EPS) * gamma + beta


def _gelu(x):
    # TODO(synk): tanh-approx GELU; PyTorch nn.GELU default is the exact erf form.
    c = math.sqrt(2.0 / math.pi)
    return 0.5 * x * (1.0 + jnp.tanh(c * (x + 0.044715 * x * x * x)))


# ------------------------------ fused layer-stack kernel ---------------------
def bert_layers_kernel(valid_ref, x_ref,
                       wqkv_ref, bqkv_ref, wo_ref, bo_ref,
                       ln1g_ref, ln1b_ref, w1_ref, b1_ref, w2_ref, b2_ref,
                       ln2g_ref, ln2b_ref,
                       o_ref, xbuf, *, num_heads, dim_k):
    layer = pl.program_id(0)

    @pl.when(layer == 0)
    def _():
        xbuf[...] = x_ref[...]          # bring embeddings into the resident buffer

    x3 = xbuf[...]                      # (B, S, H) f32, VMEM-resident across layers
    B, S, H = x3.shape
    x2 = x3.reshape(B * S, H)

    valid = valid_ref[...]              # (B, S): 1.0 = real token, 0.0 = padding
    key_mask = valid[:, None, :] > 0.0  # (B, 1, S) -> broadcasts over the query axis

    nhd = num_heads * dim_k

    # Fused QKV projection: bf16 operands, f32 accumulation on the MXU.
    qkv = jnp.dot(x2.astype(jnp.bfloat16), wqkv_ref[0],
                  preferred_element_type=jnp.float32) + bqkv_ref[0]   # (B*S, 3*nhd)
    q = qkv[:, 0 * nhd:1 * nhd].reshape(B, S, nhd)
    k = qkv[:, 1 * nhd:2 * nhd].reshape(B, S, nhd)
    v = qkv[:, 2 * nhd:3 * nhd].reshape(B, S, nhd)

    scale = 1.0 / math.sqrt(dim_k)
    wo = wo_ref[0]                      # (nhd, H) bf16
    attn = jnp.zeros((B * S, H), jnp.float32)

    for h in range(num_heads):          # short static loop; each iter is B-batched
        sl = slice(h * dim_k, (h + 1) * dim_k)
        qh, kh, vh = q[:, :, sl], k[:, :, sl], v[:, :, sl]
        s = jnp.einsum('bqd,bkd->bqk', qh, kh,
                       preferred_element_type=jnp.float32) * scale    # (B, S, S)
        s = jnp.where(key_mask, s, -1e9)
        s = s - jnp.max(s, axis=-1, keepdims=True)
        p = jnp.exp(s)
        p = p * pl.reciprocal(jnp.sum(p, axis=-1, keepdims=True), approx=True)
        ctx = jnp.einsum('bqk,bkd->bqd', p, vh,
                         preferred_element_type=jnp.float32)          # (B, S, dk)
        # Fold this head's slice of W_O directly (no lane-axis concatenate).
        attn = attn + jnp.dot(ctx.reshape(B * S, dim_k).astype(jnp.bfloat16),
                              wo[sl, :], preferred_element_type=jnp.float32)
    attn = attn + bo_ref[0]

    h1 = _layernorm(x2 + attn, ln1g_ref[0], ln1b_ref[0])

    ff = jnp.dot(h1.astype(jnp.bfloat16), w1_ref[0],
                 preferred_element_type=jnp.float32) + b1_ref[0]
    ff = _gelu(ff)
    ff = jnp.dot(ff.astype(jnp.bfloat16), w2_ref[0],
                 preferred_element_type=jnp.float32) + b2_ref[0]
    h2 = _layernorm(h1 + ff, ln2g_ref[0], ln2b_ref[0])

    xbuf[...] = h2.reshape(B, S, H)     # stays resident for the next layer

    @pl.when(layer == pl.num_programs(0) - 1)
    def _():
        o_ref[...] = xbuf[...]          # single HBM writeback at the end


# ------------------------------ parameter init ------------------------------
def init_layer_params(key):
    ks = jax.random.split(key, 6)
    std = 0.02
    nhd = NUM_HEADS * DIM_K
    wq = jax.random.normal(ks[0], (HIDDEN, nhd), jnp.float32) * std
    wk = jax.random.normal(ks[1], (HIDDEN, nhd), jnp.float32) * std
    wv = jax.random.normal(ks[2], (HIDDEN, nhd), jnp.float32) * std
    return {
        "wqkv": jnp.concatenate([wq, wk, wv], axis=1).astype(jnp.bfloat16),
        "bqkv": jnp.zeros((1, 3 * nhd), jnp.float32),
        "wo": (jax.random.normal(ks[3], (nhd, HIDDEN), jnp.float32) * std
               ).astype(jnp.bfloat16),
        "bo": jnp.zeros((1, HIDDEN), jnp.float32),
        "ln1_g": jnp.ones((1, HIDDEN), jnp.float32),
        "ln1_b": jnp.zeros((1, HIDDEN), jnp.float32),
        "w1": (jax.random.normal(ks[4], (HIDDEN, DIM_FF), jnp.float32) * std
               ).astype(jnp.bfloat16),
        "b1": jnp.zeros((1, DIM_FF), jnp.float32),
        "w2": (jax.random.normal(ks[5], (DIM_FF, HIDDEN), jnp.float32) * std
               ).astype(jnp.bfloat16),
        "b2": jnp.zeros((1, HIDDEN), jnp.float32),
        "ln2_g": jnp.ones((1, HIDDEN), jnp.float32),
        "ln2_b": jnp.zeros((1, HIDDEN), jnp.float32),
    }


WEIGHT_NAMES = ["wqkv", "bqkv", "wo", "bo", "ln1_g", "ln1_b",
                "w1", "b1", "w2", "b2", "ln2_g", "ln2_b"]


def init_stacked_params(key, num_layers):
    keys = jax.random.split(key, num_layers)
    per_layer = [init_layer_params(k) for k in keys]
    return {name: jnp.stack([p[name] for p in per_layer], axis=0)
            for name in WEIGHT_NAMES}


def sinusoidal_positional_encoding(seq_len, dim):
    pos = jnp.arange(seq_len, dtype=jnp.float32)[:, None]
    i = jnp.arange(0, dim, 2, dtype=jnp.float32)
    div = jnp.exp(-jnp.log(10000.0) * i / dim)
    pe = jnp.zeros((seq_len, dim), jnp.float32)
    pe = pe.at[:, 0::2].set(jnp.sin(pos * div))
    pe = pe.at[:, 1::2].set(jnp.cos(pos * div))
    return pe


# ------------------------------ full forward --------------------------------
def bert_custom_forward(sequences, tok_emb, stacked_params):
    B, S = sequences.shape
    num_layers = stacked_params["wqkv"].shape[0]

    # mask = (sequences > 0) over the KEY axis, kept as a (B, S) vector;
    # broadcast to (B, S, S) happens inside the kernel (free VPU op).
    valid = (sequences > 0).astype(jnp.float32)

    # CombEmbedding: token embedding (padding_idx=0) + sinusoidal positional enc.
    x = tok_emb[sequences] + sinusoidal_positional_encoding(S, HIDDEN)[None]
    x = x.astype(jnp.float32)

    in_specs = [
        pl.BlockSpec((B, S), lambda l: (0, 0)),            # valid mask
        pl.BlockSpec((B, S, HIDDEN), lambda l: (0, 0, 0)),  # embeddings
    ]
    args = [valid, x]
    for name in WEIGHT_NAMES:                               # layer-stacked weights
        p = stacked_params[name]
        args.append(p)
        in_specs.append(pl.BlockSpec((1,) + p.shape[1:], lambda l: (l, 0, 0)))

    kernel = functools.partial(bert_layers_kernel,
                               num_heads=NUM_HEADS, dim_k=DIM_K)

    return pl.pallas_call(
        kernel,
        out_shape=jax.ShapeDtypeStruct((B, S, HIDDEN), jnp.float32),
        grid=(num_layers,),
        in_specs=in_specs,
        out_specs=pl.BlockSpec((B, S, HIDDEN), lambda l: (0, 0, 0)),
        scratch_shapes=[pltpu.VMEM((B, S, HIDDEN), jnp.float32)],
        compiler_params=pltpu.CompilerParams(
            dimension_semantics=("arbitrary",)),
    )(*args)


# ---------------------------------- main -------------------------------------
if __name__ == "__main__":
    root = jax.random.PRNGKey(0)
    k_seq, k_emb, k_layers = jax.random.split(root, 3)

    # Deterministic token ids; include some padding (0) tokens.
    sequences = jax.random.randint(k_seq, (BATCH, SEQ), 0, VOCAB_SIZE,
                                   dtype=jnp.int32)
    sequences = sequences.at[:, -2:].set(0)   # force some padding positions

    tok_emb = jax.random.normal(k_emb, (VOCAB_SIZE, HIDDEN), jnp.float32) * 0.02
    tok_emb = tok_emb.at[0].set(0.0)          # padding_idx = 0

    stacked_params = init_stacked_params(k_layers, NUM_LAYERS)

    out = bert_custom_forward(sequences, tok_emb, stacked_params)
    out = jax.block_until_ready(out)

    assert out.shape == (BATCH, SEQ, HIDDEN)
    assert bool(jnp.all(jnp.isfinite(out)))
    print("KERNEL_OK")
</pallas_src>

<mosaic_0001>
module attributes {stable_mosaic.version = 11 : i64} {
  func.func @bert_layers_kernel(%arg0: i32, %arg1: memref<2x8xf32, #tpu.memory_space<vmem>>, %arg2: memref<2x8x128xf32, #tpu.memory_space<vmem>>, %arg3: memref<1x128x384xbf16, #tpu.memory_space<vmem>>, %arg4: memref<1x1x384xf32, #tpu.memory_space<vmem>>, %arg5: memref<1x128x128xbf16, #tpu.memory_space<vmem>>, %arg6: memref<1x1x128xf32, #tpu.memory_space<vmem>>, %arg7: memref<1x1x128xf32, #tpu.memory_space<vmem>>, %arg8: memref<1x1x128xf32, #tpu.memory_space<vmem>>, %arg9: memref<1x128x512xbf16, #tpu.memory_space<vmem>>, %arg10: memref<1x1x512xf32, #tpu.memory_space<vmem>>, %arg11: memref<1x512x128xbf16, #tpu.memory_space<vmem>>, %arg12: memref<1x1x128xf32, #tpu.memory_space<vmem>>, %arg13: memref<1x1x128xf32, #tpu.memory_space<vmem>>, %arg14: memref<1x1x128xf32, #tpu.memory_space<vmem>>, %arg15: memref<2x8x128xf32, #tpu.memory_space<vmem>>, %arg16: memref<2x8x128xf32, #tpu.memory_space<vmem>>) attributes {dimension_semantics = [#tpu.dimension_semantics<arbitrary>], iteration_bounds = array<i64: 2>, scalar_prefetch = 0 : i64, scratch_operands = 1 : i64, tpu.core_type = #tpu.core_type<tc>, window_params = [{pipeline_mode = #tpu.pipeline_mode<synchronous>, transform_indices = @transform_0, window_bounds = array<i64: 2, 8>}, {pipeline_mode = #tpu.pipeline_mode<synchronous>, transform_indices = @transform_1, window_bounds = array<i64: 2, 8, 128>}, {transform_indices = @transform_2, window_bounds = array<i64: 1, 128, 384>}, {transform_indices = @transform_3, window_bounds = array<i64: 1, 1, 384>}, {transform_indices = @transform_4, window_bounds = array<i64: 1, 128, 128>}, {transform_indices = @transform_5, window_bounds = array<i64: 1, 1, 128>}, {transform_indices = @transform_6, window_bounds = array<i64: 1, 1, 128>}, {transform_indices = @transform_7, window_bounds = array<i64: 1, 1, 128>}, {transform_indices = @transform_8, window_bounds = array<i64: 1, 128, 512>}, {transform_indices = @transform_9, window_bounds = array<i64: 1, 1, 512>}, {transform_indices = @transform_10, window_bounds = array<i64: 1, 512, 128>}, {transform_indices = @transform_11, window_bounds = array<i64: 1, 1, 128>}, {transform_indices = @transform_12, window_bounds = array<i64: 1, 1, 128>}, {transform_indices = @transform_13, window_bounds = array<i64: 1, 1, 128>}, {pipeline_mode = #tpu.pipeline_mode<synchronous>, transform_indices = @transform_14, window_bounds = array<i64: 2, 8, 128>}]} {
    %c0_i32 = arith.constant 0 : i32
    %0 = arith.cmpi eq, %arg0, %c0_i32 : i32
    %1 = arith.extui %0 : i1 to i32
    %c0_i32_0 = arith.constant 0 : i32
    %2 = arith.cmpi ne, %1, %c0_i32_0 : i32
    scf.if %2 {
      %c0_91 = arith.constant 0 : index
      %c0_92 = arith.constant 0 : index
      %c0_93 = arith.constant 0 : index
      %222 = vector.load %arg2[%c0_91, %c0_92, %c0_93] : memref<2x8x128xf32, #tpu.memory_space<vmem>>, vector<2x8x128xf32>
      %c0_94 = arith.constant 0 : index
      %c0_95 = arith.constant 0 : index
      %c0_96 = arith.constant 0 : index
      %223 = vector.load %arg16[%c0_94, %c0_95, %c0_96] : memref<2x8x128xf32, #tpu.memory_space<vmem>>, vector<2x8x128xf32>
      tpu.vector_store %arg16[%c0_94, %c0_95, %c0_96], %222 {strides = array<i32>} : memref<2x8x128xf32, #tpu.memory_space<vmem>>, vector<2x8x128xf32>,
    } else {
    }
    %c0 = arith.constant 0 : index
    %c0_1 = arith.constant 0 : index
    %c0_2 = arith.constant 0 : index
    %3 = vector.load %arg16[%c0, %c0_1, %c0_2] : memref<2x8x128xf32, #tpu.memory_space<vmem>>, vector<2x8x128xf32>
    %4 = vector.shape_cast %3 : vector<2x8x128xf32> to vector<16x128xf32>
    %c0_3 = arith.constant 0 : index
    %c0_4 = arith.constant 0 : index
    %5 = vector.load %arg1[%c0_3, %c0_4] : memref<2x8xf32, #tpu.memory_space<vmem>>, vector<2x8xf32>
    %6 = vector.shape_cast %5 : vector<2x8xf32> to vector<2x1x8xf32>
    %cst = arith.constant 0.000000e+00 : f32
    %7 = vector.broadcast %cst : f32 to vector<2x1x8xf32>
    %8 = arith.cmpf ogt, %6, %7 : vector<2x1x8xf32>
    %9 = arith.truncf %4 : vector<16x128xf32> to vector<16x128xbf16>
    %c0_5 = arith.constant 0 : index
    %c0_6 = arith.constant 0 : index
    %c0_7 = arith.constant 0 : index
    %10 = vector.load %arg3[%c0_5, %c0_6, %c0_7] : memref<1x128x384xbf16, #tpu.memory_space<vmem>>, vector<1x128x384xbf16>
    %11 = vector.shape_cast %10 : vector<1x128x384xbf16> to vector<128x384xbf16>
    %cst_8 = arith.constant dense<0.000000e+00> : vector<16x384xf32>
    %12 = tpu.matmul %9, %11, %cst_8 {dimension_numbers = #tpu.dot_dimension_numbers<[1], [0], [0], [1], [0, 0, 1, 1], [], []>} : vector<16x128xbf16>, vector<128x384xbf16>, vector<16x384xf32> -> vector<16x384xf32>
    %c0_9 = arith.constant 0 : index
    %c0_10 = arith.constant 0 : index
    %c0_11 = arith.constant 0 : index
    %13 = vector.load %arg4[%c0_9, %c0_10, %c0_11] : memref<1x1x384xf32, #tpu.memory_space<vmem>>, vector<1x1x384xf32>
    %14 = vector.shape_cast %13 : vector<1x1x384xf32> to vector<1x384xf32>
    %15 = vector.broadcast %14 : vector<1x384xf32> to vector<16x384xf32>
    %16 = arith.addf %12, %15 : vector<16x384xf32>
    %17 = vector.extract_strided_slice %16 {offsets = [0, 0], sizes = [16, 128], strides = [1, 1]} : vector<16x384xf32> to vector<16x128xf32>
    %18 = vector.shape_cast %17 : vector<16x128xf32> to vector<2x8x128xf32>
    %19 = vector.extract_strided_slice %16 {offsets = [0, 128], sizes = [16, 128], strides = [1, 1]} : vector<16x384xf32> to vector<16x128xf32>
    %20 = vector.shape_cast %19 : vector<16x128xf32> to vector<2x8x128xf32>
    %21 = vector.extract_strided_slice %16 {offsets = [0, 256], sizes = [16, 128], strides = [1, 1]} : vector<16x384xf32> to vector<16x128xf32>
    %22 = vector.shape_cast %21 : vector<16x128xf32> to vector<2x8x128xf32>
    %c0_12 = arith.constant 0 : index
    %c0_13 = arith.constant 0 : index
    %c0_14 = arith.constant 0 : index
    %23 = vector.load %arg5[%c0_12, %c0_13, %c0_14] : memref<1x128x128xbf16, #tpu.memory_space<vmem>>, vector<1x128x128xbf16>
    %24 = vector.shape_cast %23 : vector<1x128x128xbf16> to vector<128x128xbf16>
    %cst_15 = arith.constant 0.000000e+00 : f32
    %25 = vector.broadcast %cst_15 : f32 to vector<16x128xf32>
    %26 = vector.extract_strided_slice %18 {offsets = [0, 0, 0], sizes = [2, 8, 32], strides = [1, 1, 1]} : vector<2x8x128xf32> to vector<2x8x32xf32>
    %27 = vector.extract_strided_slice %20 {offsets = [0, 0, 0], sizes = [2, 8, 32], strides = [1, 1, 1]} : vector<2x8x128xf32> to vector<2x8x32xf32>
    %28 = vector.extract_strided_slice %22 {offsets = [0, 0, 0], sizes = [2, 8, 32], strides = [1, 1, 1]} : vector<2x8x128xf32> to vector<2x8x32xf32>
    "tpu.trace_start"() <{level = 10 : i32, message = "bqd,bkd->bqk"}> : () -> ()
    %cst_16 = arith.constant dense<0.000000e+00> : vector<2x8x8xf32>
    %29 = tpu.matmul %26, %27, %cst_16 {dimension_numbers = #tpu.dot_dimension_numbers<[2], [2], [1], [1], [0, 0, 0, 1, 1, 1], [0], [0]>} : vector<2x8x32xf32>, vector<2x8x32xf32>, vector<2x8x8xf32> -> vector<2x8x8xf32>
    "tpu.trace_stop"() : () -> ()
    %cst_17 = arith.constant 0.176776692 : f32
    %30 = vector.broadcast %cst_17 : f32 to vector<2x8x8xf32>
    %31 = arith.mulf %29, %30 : vector<2x8x8xf32>
    %cst_18 = arith.constant -1.000000e+09 : f32
    %32 = vector.shape_cast %8 : vector<2x1x8xi1> to vector<2x1x8xi1>
    %33 = vector.broadcast %32 : vector<2x1x8xi1> to vector<2x8x8xi1>
    %34 = vector.broadcast %cst_18 : f32 to vector<2x8x8xf32>
    %35 = arith.select %33, %31, %34 : vector<2x8x8xi1>, vector<2x8x8xf32>
    %cst_19 = arith.constant dense<0xFF800000> : vector<2x8xf32>
    %36 = vector.multi_reduction <maximumf>, %35, %cst_19 [2] : vector<2x8x8xf32> to vector<2x8xf32>
    %37 = vector.shape_cast %36 : vector<2x8xf32> to vector<2x8x1xf32>
    %38 = vector.broadcast %37 : vector<2x8x1xf32> to vector<2x8x8xf32>
    %39 = arith.subf %35, %38 : vector<2x8x8xf32>
    %40 = math.exp %39 : vector<2x8x8xf32>
    %cst_20 = arith.constant dense<0.000000e+00> : vector<2x8xf32>
    %41 = vector.multi_reduction <add>, %40, %cst_20 [2] : vector<2x8x8xf32> to vector<2x8xf32>
    %42 = vector.shape_cast %41 : vector<2x8xf32> to vector<2x8x1xf32>
    %43 = tpu.reciprocal %42 {approx = true} : vector<2x8x1xf32> -> vector<2x8x1xf32>
    %44 = vector.broadcast %43 : vector<2x8x1xf32> to vector<2x8x8xf32>
    %45 = arith.mulf %40, %44 : vector<2x8x8xf32>
    "tpu.trace_start"() <{level = 10 : i32, message = "bqk,bkd->bqd"}> : () -> ()
    %cst_21 = arith.constant dense<0.000000e+00> : vector<2x8x32xf32>
    %46 = tpu.matmul %45, %28, %cst_21 {dimension_numbers = #tpu.dot_dimension_numbers<[2], [1], [1], [2], [0, 0, 0, 1, 1, 2], [0], [0]>} : vector<2x8x8xf32>, vector<2x8x32xf32>, vector<2x8x32xf32> -> vector<2x8x32xf32>
    "tpu.trace_stop"() : () -> ()
    %47 = vector.shape_cast %46 : vector<2x8x32xf32> to vector<16x32xf32>
    %48 = arith.truncf %47 : vector<16x32xf32> to vector<16x32xbf16>
    %49 = vector.extract_strided_slice %24 {offsets = [0, 0], sizes = [32, 128], strides = [1, 1]} : vector<128x128xbf16> to vector<32x128xbf16>
    %cst_22 = arith.constant dense<0.000000e+00> : vector<16x128xf32>
    %50 = tpu.matmul %48, %49, %cst_22 {dimension_numbers = #tpu.dot_dimension_numbers<[1], [0], [0], [1], [0, 0, 1, 1], [], []>} : vector<16x32xbf16>, vector<32x128xbf16>, vector<16x128xf32> -> vector<16x128xf32>
    %51 = arith.addf %25, %50 : vector<16x128xf32>
    %52 = vector.extract_strided_slice %18 {offsets = [0, 0, 32], sizes = [2, 8, 32], strides = [1, 1, 1]} : vector<2x8x128xf32> to vector<2x8x32xf32>
    %53 = vector.extract_strided_slice %20 {offsets = [0, 0, 32], sizes = [2, 8, 32], strides = [1, 1, 1]} : vector<2x8x128xf32> to vector<2x8x32xf32>
    %54 = vector.extract_strided_slice %22 {offsets = [0, 0, 32], sizes = [2, 8, 32], strides = [1, 1, 1]} : vector<2x8x128xf32> to vector<2x8x32xf32>
    "tpu.trace_start"() <{level = 10 : i32, message = "bqd,bkd->bqk"}> : () -> ()
    %cst_23 = arith.constant dense<0.000000e+00> : vector<2x8x8xf32>
    %55 = tpu.matmul %52, %53, %cst_23 {dimension_numbers = #tpu.dot_dimension_numbers<[2], [2], [1], [1], [0, 0, 0, 1, 1, 1], [0], [0]>} : vector<2x8x32xf32>, vector<2x8x32xf32>, vector<2x8x8xf32> -> vector<2x8x8xf32>
    "tpu.trace_stop"() : () -> ()
    %cst_24 = arith.constant 0.176776692 : f32
    %56 = vector.broadcast %cst_24 : f32 to vector<2x8x8xf32>
    %57 = arith.mulf %55, %56 : vector<2x8x8xf32>
    %cst_25 = arith.constant -1.000000e+09 : f32
    %58 = vector.shape_cast %8 : vector<2x1x8xi1> to vector<2x1x8xi1>
    %59 = vector.broadcast %58 : vector<2x1x8xi1> to vector<2x8x8xi1>
    %60 = vector.broadcast %cst_25 : f32 to vector<2x8x8xf32>
    %61 = arith.select %59, %57, %60 : vector<2x8x8xi1>, vector<2x8x8xf32>
    %cst_26 = arith.constant dense<0xFF800000> : vector<2x8xf32>
    %62 = vector.multi_reduction <maximumf>, %61, %cst_26 [2] : vector<2x8x8xf32> to vector<2x8xf32>
    %63 = vector.shape_cast %62 : vector<2x8xf32> to vector<2x8x1xf32>
    %64 = vector.broadcast %63 : vector<2x8x1xf32> to vector<2x8x8xf32>
    %65 = arith.subf %61, %64 : vector<2x8x8xf32>
    %66 = math.exp %65 : vector<2x8x8xf32>
    %cst_27 = arith.constant dense<0.000000e+00> : vector<2x8xf32>
    %67 = vector.multi_reduction <add>, %66, %cst_27 [2] : vector<2x8x8xf32> to vector<2x8xf32>
    %68 = vector.shape_cast %67 : vector<2x8xf32> to vector<2x8x1xf32>
    %69 = tpu.reciprocal %68 {approx = true} : vector<2x8x1xf32> -> vector<2x8x1xf32>
    %70 = vector.broadcast %69 : vector<2x8x1xf32> to vector<2x8x8xf32>
    %71 = arith.mulf %66, %70 : vector<2x8x8xf32>
    "tpu.trace_start"() <{level = 10 : i32, message = "bqk,bkd->bqd"}> : () -> ()
    %cst_28 = arith.constant dense<0.000000e+00> : vector<2x8x32xf32>
    %72 = tpu.matmul %71, %54, %cst_28 {dimension_numbers = #tpu.dot_dimension_numbers<[2], [1], [1], [2], [0, 0, 0, 1, 1, 2], [0], [0]>} : vector<2x8x8xf32>, vector<2x8x32xf32>, vector<2x8x32xf32> -> vector<2x8x32xf32>
    "tpu.trace_stop"() : () -> ()
    %73 = vector.shape_cast %72 : vector<2x8x32xf32> to vector<16x32xf32>
    %74 = arith.truncf %73 : vector<16x32xf32> to vector<16x32xbf16>
    %75 = vector.extract_strided_slice %24 {offsets = [32, 0], sizes = [32, 128], strides = [1, 1]} : vector<128x128xbf16> to vector<32x128xbf16>
    %cst_29 = arith.constant dense<0.000000e+00> : vector<16x128xf32>
    %76 = tpu.matmul %74, %75, %cst_29 {dimension_numbers = #tpu.dot_dimension_numbers<[1], [0], [0], [1], [0, 0, 1, 1], [], []>} : vector<16x32xbf16>, vector<32x128xbf16>, vector<16x128xf32> -> vector<16x128xf32>
    %77 = arith.addf %51, %76 : vector<16x128xf32>
    %78 = vector.extract_strided_slice %18 {offsets = [0, 0, 64], sizes = [2, 8, 32], strides = [1, 1, 1]} : vector<2x8x128xf32> to vector<2x8x32xf32>
    %79 = vector.extract_strided_slice %20 {offsets = [0, 0, 64], sizes = [2, 8, 32], strides = [1, 1, 1]} : vector<2x8x128xf32> to vector<2x8x32xf32>
    %80 = vector.extract_strided_slice %22 {offsets = [0, 0, 64], sizes = [2, 8, 32], strides = [1, 1, 1]} : vector<2x8x128xf32> to vector<2x8x32xf32>
    "tpu.trace_start"() <{level = 10 : i32, message = "bqd,bkd->bqk"}> : () -> ()
    %cst_30 = arith.constant dense<0.000000e+00> : vector<2x8x8xf32>
    %81 = tpu.matmul %78, %79, %cst_30 {dimension_numbers = #tpu.dot_dimension_numbers<[2], [2], [1], [1], [0, 0, 0, 1, 1, 1], [0], [0]>} : vector<2x8x32xf32>, vector<2x8x32xf32>, vector<2x8x8xf32> -> vector<2x8x8xf32>
    "tpu.trace_stop"() : () -> ()
    %cst_31 = arith.constant 0.176776692 : f32
    %82 = vector.broadcast %cst_31 : f32 to vector<2x8x8xf32>
    %83 = arith.mulf %81, %82 : vector<2x8x8xf32>
    %cst_32 = arith.constant -1.000000e+09 : f32
    %84 = vector.shape_cast %8 : vector<2x1x8xi1> to vector<2x1x8xi1>
    %85 = vector.broadcast %84 : vector<2x1x8xi1> to vector<2x8x8xi1>
    %86 = vector.broadcast %cst_32 : f32 to vector<2x8x8xf32>
    %87 = arith.select %85, %83, %86 : vector<2x8x8xi1>, vector<2x8x8xf32>
    %cst_33 = arith.constant dense<0xFF800000> : vector<2x8xf32>
    %88 = vector.multi_reduction <maximumf>, %87, %cst_33 [2] : vector<2x8x8xf32> to vector<2x8xf32>
    %89 = vector.shape_cast %88 : vector<2x8xf32> to vector<2x8x1xf32>
    %90 = vector.broadcast %89 : vector<2x8x1xf32> to vector<2x8x8xf32>
    %91 = arith.subf %87, %90 : vector<2x8x8xf32>
    %92 = math.exp %91 : vector<2x8x8xf32>
    %cst_34 = arith.constant dense<0.000000e+00> : vector<2x8xf32>
    %93 = vector.multi_reduction <add>, %92, %cst_34 [2] : vector<2x8x8xf32> to vector<2x8xf32>
    %94 = vector.shape_cast %93 : vector<2x8xf32> to vector<2x8x1xf32>
    %95 = tpu.reciprocal %94 {approx = true} : vector<2x8x1xf32> -> vector<2x8x1xf32>
    %96 = vector.broadcast %95 : vector<2x8x1xf32> to vector<2x8x8xf32>
    %97 = arith.mulf %92, %96 : vector<2x8x8xf32>
    "tpu.trace_start"() <{level = 10 : i32, message = "bqk,bkd->bqd"}> : () -> ()
    %cst_35 = arith.constant dense<0.000000e+00> : vector<2x8x32xf32>
    %98 = tpu.matmul %97, %80, %cst_35 {dimension_numbers = #tpu.dot_dimension_numbers<[2], [1], [1], [2], [0, 0, 0, 1, 1, 2], [0], [0]>} : vector<2x8x8xf32>, vector<2x8x32xf32>, vector<2x8x32xf32> -> vector<2x8x32xf32>
    "tpu.trace_stop"() : () -> ()
    %99 = vector.shape_cast %98 : vector<2x8x32xf32> to vector<16x32xf32>
    %100 = arith.truncf %99 : vector<16x32xf32> to vector<16x32xbf16>
    %101 = vector.extract_strided_slice %24 {offsets = [64, 0], sizes = [32, 128], strides = [1, 1]} : vector<128x128xbf16> to vector<32x128xbf16>
    %cst_36 = arith.constant dense<0.000000e+00> : vector<16x128xf32>
    %102 = tpu.matmul %100, %101, %cst_36 {dimension_numbers = #tpu.dot_dimension_numbers<[1], [0], [0], [1], [0, 0, 1, 1], [], []>} : vector<16x32xbf16>, vector<32x128xbf16>, vector<16x128xf32> -> vector<16x128xf32>
    %103 = arith.addf %77, %102 : vector<16x128xf32>
    %104 = vector.extract_strided_slice %18 {offsets = [0, 0, 96], sizes = [2, 8, 32], strides = [1, 1, 1]} : vector<2x8x128xf32> to vector<2x8x32xf32>
    %105 = vector.extract_strided_slice %20 {offsets = [0, 0, 96], sizes = [2, 8, 32], strides = [1, 1, 1]} : vector<2x8x128xf32> to vector<2x8x32xf32>
    %106 = vector.extract_strided_slice %22 {offsets = [0, 0, 96], sizes = [2, 8, 32], strides = [1, 1, 1]} : vector<2x8x128xf32> to vector<2x8x32xf32>
    "tpu.trace_start"() <{level = 10 : i32, message = "bqd,bkd->bqk"}> : () -> ()
    %cst_37 = arith.constant dense<0.000000e+00> : vector<2x8x8xf32>
    %107 = tpu.matmul %104, %105, %cst_37 {dimension_numbers = #tpu.dot_dimension_numbers<[2], [2], [1], [1], [0, 0, 0, 1, 1, 1], [0], [0]>} : vector<2x8x32xf32>, vector<2x8x32xf32>, vector<2x8x8xf32> -> vector<2x8x8xf32>
    "tpu.trace_stop"() : () -> ()
    %cst_38 = arith.constant 0.176776692 : f32
    %108 = vector.broadcast %cst_38 : f32 to vector<2x8x8xf32>
    %109 = arith.mulf %107, %108 : vector<2x8x8xf32>
    %cst_39 = arith.constant -1.000000e+09 : f32
    %110 = vector.shape_cast %8 : vector<2x1x8xi1> to vector<2x1x8xi1>
    %111 = vector.broadcast %110 : vector<2x1x8xi1> to vector<2x8x8xi1>
    %112 = vector.broadcast %cst_39 : f32 to vector<2x8x8xf32>
    %113 = arith.select %111, %109, %112 : vector<2x8x8xi1>, vector<2x8x8xf32>
    %cst_40 = arith.constant dense<0xFF800000> : vector<2x8xf32>
    %114 = vector.multi_reduction <maximumf>, %113, %cst_40 [2] : vector<2x8x8xf32> to vector<2x8xf32>
    %115 = vector.shape_cast %114 : vector<2x8xf32> to vector<2x8x1xf32>
    %116 = vector.broadcast %115 : vector<2x8x1xf32> to vector<2x8x8xf32>
    %117 = arith.subf %113, %116 : vector<2x8x8xf32>
    %118 = math.exp %117 : vector<2x8x8xf32>
    %cst_41 = arith.constant dense<0.000000e+00> : vector<2x8xf32>
    %119 = vector.multi_reduction <add>, %118, %cst_41 [2] : vector<2x8x8xf32> to vector<2x8xf32>
    %120 = vector.shape_cast %119 : vector<2x8xf32> to vector<2x8x1xf32>
    %121 = tpu.reciprocal %120 {approx = true} : vector<2x8x1xf32> -> vector<2x8x1xf32>
    %122 = vector.broadcast %121 : vector<2x8x1xf32> to vector<2x8x8xf32>
    %123 = arith.mulf %118, %122 : vector<2x8x8xf32>
    "tpu.trace_start"() <{level = 10 : i32, message = "bqk,bkd->bqd"}> : () -> ()
    %cst_42 = arith.constant dense<0.000000e+00> : vector<2x8x32xf32>
    %124 = tpu.matmul %123, %106, %cst_42 {dimension_numbers = #tpu.dot_dimension_numbers<[2], [1], [1], [2], [0, 0, 0, 1, 1, 2], [0], [0]>} : vector<2x8x8xf32>, vector<2x8x32xf32>, vector<2x8x32xf32> -> vector<2x8x32xf32>
    "tpu.trace_stop"() : () -> ()
    %125 = vector.shape_cast %124 : vector<2x8x32xf32> to vector<16x32xf32>
    %126 = arith.truncf %125 : vector<16x32xf32> to vector<16x32xbf16>
    %127 = vector.extract_strided_slice %24 {offsets = [96, 0], sizes = [32, 128], strides = [1, 1]} : vector<128x128xbf16> to vector<32x128xbf16>
    %cst_43 = arith.constant dense<0.000000e+00> : vector<16x128xf32>
    %128 = tpu.matmul %126, %127, %cst_43 {dimension_numbers = #tpu.dot_dimension_numbers<[1], [0], [0], [1], [0, 0, 1, 1], [], []>} : vector<16x32xbf16>, vector<32x128xbf16>, vector<16x128xf32> -> vector<16x128xf32>
    %129 = arith.addf %103, %128 : vector<16x128xf32>
    %c0_44 = arith.constant 0 : index
    %c0_45 = arith.constant 0 : index
    %c0_46 = arith.constant 0 : index
    %130 = vector.load %arg6[%c0_44, %c0_45, %c0_46] : memref<1x1x128xf32, #tpu.memory_space<vmem>>, vector<1x1x128xf32>
    %131 = vector.shape_cast %130 : vector<1x1x128xf32> to vector<1x128xf32>
    %132 = vector.broadcast %131 : vector<1x128xf32> to vector<16x128xf32>
    %133 = arith.addf %129, %132 : vector<16x128xf32>
    %134 = arith.addf %4, %133 : vector<16x128xf32>
    %c0_47 = arith.constant 0 : index
    %c0_48 = arith.constant 0 : index
    %c0_49 = arith.constant 0 : index
    %135 = vector.load %arg7[%c0_47, %c0_48, %c0_49] : memref<1x1x128xf32, #tpu.memory_space<vmem>>, vector<1x1x128xf32>
    %136 = vector.shape_cast %135 : vector<1x1x128xf32> to vector<1x128xf32>
    %c0_50 = arith.constant 0 : index
    %c0_51 = arith.constant 0 : index
    %c0_52 = arith.constant 0 : index
    %137 = vector.load %arg8[%c0_50, %c0_51, %c0_52] : memref<1x1x128xf32, #tpu.memory_space<vmem>>, vector<1x1x128xf32>
    %138 = vector.shape_cast %137 : vector<1x1x128xf32> to vector<1x128xf32>
    %cst_53 = arith.constant dense<0.000000e+00> : vector<16xf32>
    %139 = vector.multi_reduction <add>, %134, %cst_53 [1] : vector<16x128xf32> to vector<16xf32>
    %140 = vector.shape_cast %139 : vector<16xf32> to vector<16x1xf32>
    %cst_54 = arith.constant 1.280000e+02 : f32
    %141 = vector.broadcast %cst_54 : f32 to vector<16x1xf32>
    %142 = arith.divf %140, %141 : vector<16x1xf32>
    %143 = vector.broadcast %142 : vector<16x1xf32> to vector<16x128xf32>
    %144 = arith.subf %134, %143 : vector<16x128xf32>
    %145 = arith.mulf %144, %144 : vector<16x128xf32>
    %cst_55 = arith.constant dense<0.000000e+00> : vector<16xf32>
    %146 = vector.multi_reduction <add>, %145, %cst_55 [1] : vector<16x128xf32> to vector<16xf32>
    %147 = vector.shape_cast %146 : vector<16xf32> to vector<16x1xf32>
    %cst_56 = arith.constant 1.280000e+02 : f32
    %148 = vector.broadcast %cst_56 : f32 to vector<16x1xf32>
    %149 = arith.divf %147, %148 : vector<16x1xf32>
    %150 = vector.broadcast %142 : vector<16x1xf32> to vector<16x128xf32>
    %151 = arith.subf %134, %150 : vector<16x128xf32>
    %cst_57 = arith.constant 9.99999974E-6 : f32
    %152 = vector.broadcast %cst_57 : f32 to vector<16x1xf32>
    %153 = arith.addf %149, %152 : vector<16x1xf32>
    %154 = math.rsqrt %153 : vector<16x1xf32>
    %155 = vector.broadcast %154 : vector<16x1xf32> to vector<16x128xf32>
    %156 = arith.mulf %151, %155 : vector<16x128xf32>
    %157 = vector.broadcast %136 : vector<1x128xf32> to vector<16x128xf32>
    %158 = arith.mulf %156, %157 : vector<16x128xf32>
    %159 = vector.broadcast %138 : vector<1x128xf32> to vector<16x128xf32>
    %160 = arith.addf %158, %159 : vector<16x128xf32>
    %161 = arith.truncf %160 : vector<16x128xf32> to vector<16x128xbf16>
    %c0_58 = arith.constant 0 : index
    %c0_59 = arith.constant 0 : index
    %c0_60 = arith.constant 0 : index
    %162 = vector.load %arg9[%c0_58, %c0_59, %c0_60] : memref<1x128x512xbf16, #tpu.memory_space<vmem>>, vector<1x128x512xbf16>
    %163 = vector.shape_cast %162 : vector<1x128x512xbf16> to vector<128x512xbf16>
    %cst_61 = arith.constant dense<0.000000e+00> : vector<16x512xf32>
    %164 = tpu.matmul %161, %163, %cst_61 {dimension_numbers = #tpu.dot_dimension_numbers<[1], [0], [0], [1], [0, 0, 1, 1], [], []>} : vector<16x128xbf16>, vector<128x512xbf16>, vector<16x512xf32> -> vector<16x512xf32>
    %c0_62 = arith.constant 0 : index
    %c0_63 = arith.constant 0 : index
    %c0_64 = arith.constant 0 : index
    %165 = vector.load %arg10[%c0_62, %c0_63, %c0_64] : memref<1x1x512xf32, #tpu.memory_space<vmem>>, vector<1x1x512xf32>
    %166 = vector.shape_cast %165 : vector<1x1x512xf32> to vector<1x512xf32>
    %167 = vector.broadcast %166 : vector<1x512xf32> to vector<16x512xf32>
    %168 = arith.addf %164, %167 : vector<16x512xf32>
    %cst_65 = arith.constant 5.000000e-01 : f32
    %169 = vector.broadcast %cst_65 : f32 to vector<16x512xf32>
    %170 = arith.mulf %169, %168 : vector<16x512xf32>
    %cst_66 = arith.constant 4.471500e-02 : f32
    %171 = vector.broadcast %cst_66 : f32 to vector<16x512xf32>
    %172 = arith.mulf %171, %168 : vector<16x512xf32>
    %173 = arith.mulf %172, %168 : vector<16x512xf32>
    %174 = arith.mulf %173, %168 : vector<16x512xf32>
    %175 = arith.addf %168, %174 : vector<16x512xf32>
    %cst_67 = arith.constant 0.797884583 : f32
    %176 = vector.broadcast %cst_67 : f32 to vector<16x512xf32>
    %177 = arith.mulf %176, %175 : vector<16x512xf32>
    %178 = math.tanh %177 : vector<16x512xf32>
    %cst_68 = arith.constant 1.000000e+00 : f32
    %179 = vector.broadcast %cst_68 : f32 to vector<16x512xf32>
    %180 = arith.addf %179, %178 : vector<16x512xf32>
    %181 = arith.mulf %170, %180 : vector<16x512xf32>
    %182 = arith.truncf %181 : vector<16x512xf32> to vector<16x512xbf16>
    %c0_69 = arith.constant 0 : index
    %c0_70 = arith.constant 0 : index
    %c0_71 = arith.constant 0 : index
    %183 = vector.load %arg11[%c0_69, %c0_70, %c0_71] : memref<1x512x128xbf16, #tpu.memory_space<vmem>>, vector<1x512x128xbf16>
    %184 = vector.shape_cast %183 : vector<1x512x128xbf16> to vector<512x128xbf16>
    %cst_72 = arith.constant dense<0.000000e+00> : vector<16x128xf32>
    %185 = tpu.matmul %182, %184, %cst_72 {dimension_numbers = #tpu.dot_dimension_numbers<[1], [0], [0], [1], [0, 0, 1, 1], [], []>} : vector<16x512xbf16>, vector<512x128xbf16>, vector<16x128xf32> -> vector<16x128xf32>
    %c0_73 = arith.constant 0 : index
    %c0_74 = arith.constant 0 : index
    %c0_75 = arith.constant 0 : index
    %186 = vector.load %arg12[%c0_73, %c0_74, %c0_75] : memref<1x1x128xf32, #tpu.memory_space<vmem>>, vector<1x1x128xf32>
    %187 = vector.shape_cast %186 : vector<1x1x128xf32> to vector<1x128xf32>
    %188 = vector.broadcast %187 : vector<1x128xf32> to vector<16x128xf32>
    %189 = arith.addf %185, %188 : vector<16x128xf32>
    %190 = arith.addf %160, %189 : vector<16x128xf32>
    %c0_76 = arith.constant 0 : index
    %c0_77 = arith.constant 0 : index
    %c0_78 = arith.constant 0 : index
    %191 = vector.load %arg13[%c0_76, %c0_77, %c0_78] : memref<1x1x128xf32, #tpu.memory_space<vmem>>, vector<1x1x128xf32>
    %192 = vector.shape_cast %191 : vector<1x1x128xf32> to vector<1x128xf32>
    %c0_79 = arith.constant 0 : index
    %c0_80 = arith.constant 0 : index
    %c0_81 = arith.constant 0 : index
    %193 = vector.load %arg14[%c0_79, %c0_80, %c0_81] : memref<1x1x128xf32, #tpu.memory_space<vmem>>, vector<1x1x128xf32>
    %194 = vector.shape_cast %193 : vector<1x1x128xf32> to vector<1x128xf32>
    %cst_82 = arith.constant dense<0.000000e+00> : vector<16xf32>
    %195 = vector.multi_reduction <add>, %190, %cst_82 [1] : vector<16x128xf32> to vector<16xf32>
    %196 = vector.shape_cast %195 : vector<16xf32> to vector<16x1xf32>
    %cst_83 = arith.constant 1.280000e+02 : f32
    %197 = vector.broadcast %cst_83 : f32 to vector<16x1xf32>
    %198 = arith.divf %196, %197 : vector<16x1xf32>
    %199 = vector.broadcast %198 : vector<16x1xf32> to vector<16x128xf32>
    %200 = arith.subf %190, %199 : vector<16x128xf32>
    %201 = arith.mulf %200, %200 : vector<16x128xf32>
    %cst_84 = arith.constant dense<0.000000e+00> : vector<16xf32>
    %202 = vector.multi_reduction <add>, %201, %cst_84 [1] : vector<16x128xf32> to vector<16xf32>
    %203 = vector.shape_cast %202 : vector<16xf32> to vector<16x1xf32>
    %cst_85 = arith.constant 1.280000e+02 : f32
    %204 = vector.broadcast %cst_85 : f32 to vector<16x1xf32>
    %205 = arith.divf %203, %204 : vector<16x1xf32>
    %206 = vector.broadcast %198 : vector<16x1xf32> to vector<16x128xf32>
    %207 = arith.subf %190, %206 : vector<16x128xf32>
    %cst_86 = arith.constant 9.99999974E-6 : f32
    %208 = vector.broadcast %cst_86 : f32 to vector<16x1xf32>
    %209 = arith.addf %205, %208 : vector<16x1xf32>
    %210 = math.rsqrt %209 : vector<16x1xf32>
    %211 = vector.broadcast %210 : vector<16x1xf32> to vector<16x128xf32>
    %212 = arith.mulf %207, %211 : vector<16x128xf32>
    %213 = vector.broadcast %192 : vector<1x128xf32> to vector<16x128xf32>
    %214 = arith.mulf %212, %213 : vector<16x128xf32>
    %215 = vector.broadcast %194 : vector<1x128xf32> to vector<16x128xf32>
    %216 = arith.addf %214, %215 : vector<16x128xf32>
    %217 = vector.shape_cast %216 : vector<16x128xf32> to vector<2x8x128xf32>
    %c0_87 = arith.constant 0 : index
    %c0_88 = arith.constant 0 : index
    %c0_89 = arith.constant 0 : index
    %218 = vector.load %arg16[%c0_87, %c0_88, %c0_89] : memref<2x8x128xf32, #tpu.memory_space<vmem>>, vector<2x8x128xf32>
    tpu.vector_store %arg16[%c0_87, %c0_88, %c0_89], %217 {strides = array<i32>} : memref<2x8x128xf32, #tpu.memory_space<vmem>>, vector<2x8x128xf32>,
    %c1_i32 = arith.constant 1 : i32
    %219 = arith.cmpi eq, %arg0, %c1_i32 : i32
    %220 = arith.extui %219 : i1 to i32
    %c0_i32_90 = arith.constant 0 : i32
    %221 = arith.cmpi ne, %220, %c0_i32_90 : i32
    scf.if %221 {
      %c0_91 = arith.constant 0 : index
      %c0_92 = arith.constant 0 : index
      %c0_93 = arith.constant 0 : index
      %222 = vector.load %arg16[%c0_91, %c0_92, %c0_93] : memref<2x8x128xf32, #tpu.memory_space<vmem>>, vector<2x8x128xf32>
      %c0_94 = arith.constant 0 : index
      %c0_95 = arith.constant 0 : index
      %c0_96 = arith.constant 0 : index
      %223 = vector.load %arg15[%c0_94, %c0_95, %c0_96] : memref<2x8x128xf32, #tpu.memory_space<vmem>>, vector<2x8x128xf32>
      tpu.vector_store %arg15[%c0_94, %c0_95, %c0_96], %222 {strides = array<i32>} : memref<2x8x128xf32, #tpu.memory_space<vmem>>, vector<2x8x128xf32>,
    } else {
    }
    return
  }
  func.func @transform_0(%arg0: i32) -> (i32, i32) {
    %c0_i32 = arith.constant 0 : i32
    %c0_i32_0 = arith.constant 0 : i32
    %c0_i32_1 = arith.constant 0 : i32
    return %c0_i32, %c0_i32_0 : i32, i32
  }
  func.func @transform_1(%arg0: i32) -> (i32, i32, i32) {
    %c0_i32 = arith.constant 0 : i32
    %c0_i32_0 = arith.constant 0 : i32
    %c0_i32_1 = arith.constant 0 : i32
    %c0_i32_2 = arith.constant 0 : i32
    return %c0_i32, %c0_i32_0, %c0_i32_1 : i32, i32, i32
  }
  func.func @transform_2(%arg0: i32) -> (i32, i32, i32) {
    %c0_i32 = arith.constant 0 : i32
    %c0_i32_0 = arith.constant 0 : i32
    %c0_i32_1 = arith.constant 0 : i32
    return %arg0, %c0_i32, %c0_i32_0 : i32, i32, i32
  }
  func.func @transform_3(%arg0: i32) -> (i32, i32, i32) {
    %c0_i32 = arith.constant 0 : i32
    %c0_i32_0 = arith.constant 0 : i32
    %c0_i32_1 = arith.constant 0 : i32
    return %arg0, %c0_i32, %c0_i32_0 : i32, i32, i32
  }
  func.func @transform_4(%arg0: i32) -> (i32, i32, i32) {
    %c0_i32 = arith.constant 0 : i32
    %c0_i32_0 = arith.constant 0 : i32
    %c0_i32_1 = arith.constant 0 : i32
    return %arg0, %c0_i32, %c0_i32_0 : i32, i32, i32
  }
  func.func @transform_5(%arg0: i32) -> (i32, i32, i32) {
    %c0_i32 = arith.constant 0 : i32
    %c0_i32_0 = arith.constant 0 : i32
    %c0_i32_1 = arith.constant 0 : i32
    return %arg0, %c0_i32, %c0_i32_0 : i32, i32, i32
  }
  func.func @transform_6(%arg0: i32) -> (i32, i32, i32) {
    %c0_i32 = arith.constant 0 : i32
    %c0_i32_0 = arith.constant 0 : i32
    %c0_i32_1 = arith.constant 0 : i32
    return %arg0, %c0_i32, %c0_i32_0 : i32, i32, i32
  }
  func.func @transform_7(%arg0: i32) -> (i32, i32, i32) {
    %c0_i32 = arith.constant 0 : i32
    %c0_i32_0 = arith.constant 0 : i32
    %c0_i32_1 = arith.constant 0 : i32
    return %arg0, %c0_i32, %c0_i32_0 : i32, i32, i32
  }
  func.func @transform_8(%arg0: i32) -> (i32, i32, i32) {
    %c0_i32 = arith.constant 0 : i32
    %c0_i32_0 = arith.constant 0 : i32
    %c0_i32_1 = arith.constant 0 : i32
    return %arg0, %c0_i32, %c0_i32_0 : i32, i32, i32
  }
  func.func @transform_9(%arg0: i32) -> (i32, i32, i32) {
    %c0_i32 = arith.constant 0 : i32
    %c0_i32_0 = arith.constant 0 : i32
    %c0_i32_1 = arith.constant 0 : i32
    return %arg0, %c0_i32, %c0_i32_0 : i32, i32, i32
  }
  func.func @transform_10(%arg0: i32) -> (i32, i32, i32) {
    %c0_i32 = arith.constant 0 : i32
    %c0_i32_0 = arith.constant 0 : i32
    %c0_i32_1 = arith.constant 0 : i32
    return %arg0, %c0_i32, %c0_i32_0 : i32, i32, i32
  }
  func.func @transform_11(%arg0: i32) -> (i32, i32, i32) {
    %c0_i32 = arith.constant 0 : i32
    %c0_i32_0 = arith.constant 0 : i32
    %c0_i32_1 = arith.constant 0 : i32
    return %arg0, %c0_i32, %c0_i32_0 : i32, i32, i32
  }
  func.func @transform_12(%arg0: i32) -> (i32, i32, i32) {
    %c0_i32 = arith.constant 0 : i32
    %c0_i32_0 = arith.constant 0 : i32
    %c0_i32_1 = arith.constant 0 : i32
    return %arg0, %c0_i32, %c0_i32_0 : i32, i32, i32
  }
  func.func @transform_13(%arg0: i32) -> (i32, i32, i32) {
    %c0_i32 = arith.constant 0 : i32
    %c0_i32_0 = arith.constant 0 : i32
    %c0_i32_1 = arith.constant 0 : i32
    return %arg0, %c0_i32, %c0_i32_0 : i32, i32, i32
  }
  func.func @transform_14(%arg0: i32) -> (i32, i32, i32) {
    %c0_i32 = arith.constant 0 : i32
    %c0_i32_0 = arith.constant 0 : i32
    %c0_i32_1 = arith.constant 0 : i32
    %c0_i32_2 = arith.constant 0 : i32
    return %c0_i32, %c0_i32_0, %c0_i32_1 : i32, i32, i32
  }
}

</mosaic_0001>

<bundles_post_ra>
// kernel: tpu_custom_call.1
= control target key start
LH: loop header
LB: loop body
LE: loop exit
PB: predicated region body
PF: predicated region fallthrough
CT: control target
= control target key end

     0   :  { %s5491_s0 = inlined_call_operand.hbm [shape: f32[2,8], index: 0, kind: input, shape index: {}]   ;;  %s5492_s1 = inlined_call_operand.hbm [shape: f32[2,8,128], index: 1, kind: input, shape index: {}]   ;;  %s5493_s2 = inlined_call_operand.hbm [shape: bf16[2,128,384], index: 2, kind: input, shape index: {}]   ;;  %s5494_s3 = inlined_call_operand.hbm [shape: f32[2,1,384], index: 3, kind: input, shape index: {}]   ;;  %s5495_s4 = inlined_call_operand.hbm [shape: bf16[2,128,128], index: 4, kind: input, shape index: {}]   ;;  %s5496_s5 = inlined_call_operand.vmem [shape: f32[2,1,128], index: 5, kind: input, shape index: {}]   ;;  %s5497_s6 = inlined_call_operand.vmem [shape: f32[2,1,128], index: 6, kind: input, shape index: {}]   ;;  %s5498_s7 = inlined_call_operand.vmem [shape: f32[2,1,128], index: 7, kind: input, shape index: {}]   ;;  %s5499_s8 = inlined_call_operand.hbm [shape: bf16[2,128,512], index: 8, kind: input, shape index: {}]   ;;  %s5500_s9 = inlined_call_operand.vmem [shape: f32[2,1,512], index: 9, kind: input, shape index: {}]   ;;  %s5501_s10 = inlined_call_operand.hbm [shape: bf16[2,512,128], index: 10, kind: input, shape index: {}]   ;;  %s5502_s11 = inlined_call_operand.vmem [shape: f32[2,1,128], index: 11, kind: input, shape index: {}]   ;;  %s5503_s12 = inlined_call_operand.vmem [shape: f32[2,1,128], index: 12, kind: input, shape index: {}]   ;;  %s5504_s13 = inlined_call_operand.vmem [shape: f32[2,1,128], index: 13, kind: input, shape index: {}]   ;;  %s5505_s14 = inlined_call_operand.hbm [shape: f32[2,8,128], index: 14, kind: output, shape index: {}]  }
   0x1   :  { %5515 = sst [smem:[#allocation21_spill]] %s5491_s0 }
   0x2   :  { %5516 = sst [smem:[#allocation22_spill]] %s5492_s1 }
   0x3   :  { %5517 = sst [smem:[#allocation23_spill]] %s5493_s2 }
   0x4   :  { %5518 = sst [smem:[#allocation24_spill]] %s5494_s3 }
   0x5   :  { %5519 = sst [smem:[#allocation25_spill]] %s5496_s5 }
   0x6   :  { %5520 = sst [smem:[#allocation26_spill]] %s5497_s6 }
   0x7   :  { %5521 = sst [smem:[#allocation27_spill]] %s5498_s7 }
   0x8   :  { %5522 = sst [smem:[#allocation28_spill]] %s5500_s9 }
   0x9   :  { %5523 = sst [smem:[#allocation29_spill]] %s5502_s11 }
   0xa   :  { %5524 = sst [smem:[#allocation30_spill]] %s5503_s12 }
   0xb   :  { %5525 = sst [smem:[#allocation31_spill]] %s5504_s13 }
   0xc   :  { %5526 = sst [smem:[#allocation32_spill]] %s5505_s14 }
   0xd   :  { %19 = vsyncpa [#allocation4], 0 }
   0xe   :  { %20 = vsyncpa [#allocation7], 0 }
   0xf   :  { %21 = vsyncpa [#allocation5], 0  ;;  %s4729_s29 = smov 0   ;;  %s4731_s30 = smov 0  }
  0x10   :  { %s4733_s15 = smov 0   ;;  %s4735_s16 = smov 0  }
  0x11 LB: > { %5527 = sst [smem:[#allocation18_spill]] %s4623_s15  ;;  %s4748_s17 = sadd.s32 4294967295, %s4627_s16   ;;  %s4627_s16 = sphi %s4735_s16, %s5569_s16   ;;  %s4623_s15 = sphi %s4733_s15, %s5571_s15   ;;  %s4619_s30 = sphi %s4731_s30, %s5573_s30   ;;  %s4615_s29 = sphi %s4729_s29, %s5572_s29  }
  0x12   : > { %s4751_s18 = sadd.s32 1, %s4627_s16   ;;  %s76_s20 = sadd.s32 1, %s4623_s15 }
  0x13   : > { %5528 = sst [smem:[#allocation19_spill]] %s4751_s18  ;;  %s73_s19 = ssub.s32 %s4627_s16, %s4751_s18 }
  0x14   : > { %p74_p0 = scmp.eq.s32.totalorder %s73_s19, 0  ;;  %p83_p1 = scmp.ne.s32.totalorder %s4623_s15, %s4619_s30 }
  0x15   : > { %p84_p2 = scmp.eq.s32.totalorder %s4627_s16, 0  ;;  %p89_p3 = scmp.ne.s32.totalorder %s4619_s30, %s4615_s29 }
  0x16   : > { %s4761_s21 = scalar_select %p74_p0, %s4623_s15, %s76_s20  }
  0x17   : > { %p4763_p4 = por %p84_p2, %p83_p1  ;;  %p5506_p5 = scmp.eq.s32.totalorder %s4748_s17, 0 }
  0x18   : > { %5529 = sst [smem:[#allocation20_spill]] %s4761_s21  ;;  %p3688_p6 = scmp.ge.s32.totalorder %s4627_s16, 1 }
  0x19   : > { %p407_p7 = scmp.lt.s32.totalorder %s4627_s16, 3  ;;  %p4772_p8 = por %p5506_p5, %p89_p3 }
  0x1a   : > { %s4629_s25 = smov [#allocation3]   ;;  %p4132_p12 = scmp.lt.s32.totalorder %s4627_s16, 2 }
  0x1b   : > { %s5531_s23 = scalar_select %p4772_p8, 1, 0 }
  0x1c   : > { %p4777_p10 = pnand %p3688_p6, %p407_p7  ;;  %s420_s26 = sshll.u32 %s4629_s25, 4  ;;  %s421_s26 = int_to_ptr.vmem [resolvable:$true] %s420_s26 }
  0x1d   : > { %s444_s27 = sand.u32 1, %s4627_s16   ;;  %p4793_p0 = pnand %p4132_p12, %p4763_p4 }
  0x1e   : > { %s5532_s24 = scalar_select %p4777_p10, 1, 0 }
  0x1f   : > { %p4107_p11 = pneg %p4777_p10  ;;  %s4798_s19 = sand.u32 1, %s4623_s15  }
  0x20   : > { %s4079_s20 = smul.u32 192, %s4798_s19  ;;  %s4376_s25 = scalar_lea.vmem %s421_s26, 32 }
  0x21   : > { %p4787_p13 = pnand %p4107_p11, %p5506_p5  ;;  %p4377_p2 = scmp.ne.s32.totalorder %s421_s26, %s4376_s25 }
  0x22   : > { %p4384_p7 = scmp.lt.s32.totalorder %s421_s26, %s421_s26  ;;  %p4385_p11 = scmp.lt.s32.totalorder %s4376_s25, %s4376_s25 }
  0x23   : > { %s5533_s28 = scalar_select %p4787_p13, 1, 0 }
  0x24   : > { %p5510_p1 = pneg %p4787_p13  ;;  %p4386_p9 = por %p4385_p11, %p4384_p7 }
  0x26   : > { %p4379_p3 = pnand %p4377_p2, %p5510_p1 }
  0x28   : > { %p4380_p6 = pneg %p4379_p3 }
  0x2a   : > { %p4387_p5 = pnand %p4386_p9, %p4380_p6 }
  0x2c   : > { %4390 = shalt.err (!%p4387_p5)
}
  0x2d   : > { %s5535_s0 = sld [smem:[#allocation21_spill]]  ;;  %s4080_s15 = smul.u32 3072, %s4627_s16 }
  0x2e   : > { %s448_s18 = scalar_lea.vmem [#allocation8], %s4079_s20  ;;  %s5536_s2 = sld [smem:[#allocation23_spill]] }
  0x2f   : > { %s455_s14 = sshll.u32 %s448_s18, 4  ;;  %s4819_s11 = scalar_lea.sflag [#allocation4], %s444_s27  ;;  %s4812_s14 = int_to_ptr.vmem [resolvable:$true] %s455_s14 }
  0x30   : > { %p4825_p5 = pneg %p4793_p0 }
  0x33   : > { %4110 = dma.hbm_to_vmem [thread:$0]  (!%p4787_p13), %s5535_s0, 32, %s421_s26, [#allocation4]  }
  0x34   : > { %s4817_s25 = scalar_lea.hbm %s5536_s2, %s4080_s15  ;;  %s4396_s13 = scalar_lea.hbm %s5536_s2, 6144 }
  0x35   : > { %s4391_s9 = scalar_lea.hbm %s4817_s25, 3072  ;;  %p4397_p2 = scmp.lt.s32.totalorder %s4817_s25, %s5536_s2 }
  0x36   : > { %p4392_p4 = scmp.ne.s32.totalorder %s4817_s25, %s4391_s9  ;;  %p4398_p3 = scmp.lt.s32.totalorder %s4396_s13, %s4391_s9 }
  0x38   : > { %p4394_p9 = pnand %p4825_p5, %p4392_p4  ;;  %p4399_p6 = por %p4398_p3, %p4397_p2 }
  0x3a   : > { %p4395_p12 = pneg %p4394_p9 }
  0x3c   : > { %p4400_p7 = pnand %p4399_p6, %p4395_p12 }
  0x3e   : > { %4403 = shalt.err (!%p4400_p7)
}
  0x3f   : > { %s4404_s27 = scalar_lea.vmem %s4812_s14, 3072  ;;  %s4630_s20 = smov [#allocation8]  }
  0x40   : > { %p4405_p11 = scmp.ne.s32.totalorder %s4812_s14, %s4404_s27  ;;  %s4409_s22 = sshll.u32 %s4630_s20, 4  ;;  %s4410_s22 = int_to_ptr.vmem [resolvable:$false] %s4409_s22 }
  0x41   : > { %s4411_s18 = scalar_lea.vmem %s4410_s22, 6144  ;;  %p4412_p1 = scmp.lt.s32.totalorder %s4812_s14, %s4410_s22 }
  0x42   : > { %p4407_p4 = pnand %p4405_p11, %p4825_p5  ;;  %p4413_p8 = scmp.lt.s32.totalorder %s4411_s18, %s4404_s27 }
  0x44   : > { %p4408_p9 = pneg %p4407_p4  ;;  %p4414_p10 = por %p4413_p8, %p4412_p1 }
  0x46   : > { %p4415_p13 = pnand %p4414_p10, %p4408_p9 }
  0x48   : > { %4418 = shalt.err (!%p4415_p13)
}
  0x49   : > { %s4631_s9 = smov 192   ;;  %s4632_s12 = smov 12  }
  0x4a   : > { %4117 = dma.hbm_to_vmem [thread:$0]  (!%p4793_p0), %s4817_s25, 3072, %s4812_s14, %s4819_s11, %s4631_s9, %s4631_s9, %s4632_s12  }
  0x4b   : > { %s4081_s13 = smul.u32 3, %s4798_s19  ;;  %s3694_s15 = sshll.u32 %s4798_s19, 6 }
  0x4c   : > { %s4082_s26 = smul.u32 48, %s4627_s16  ;;  %s3847_s27 = sshll.u32 %s4627_s16, 10 }
  0x4d   : > { %s5538_s3 = sld [smem:[#allocation24_spill]]  ;;  %s469_s0 = scalar_lea.vmem [#allocation9], %s4081_s13 }
  0x4e   : > { %s477_s2 = sshll.u32 %s469_s0, 4  ;;  %s4860_s5 = scalar_lea.hbm %s5495_s4, %s3847_s27  ;;  %s478_s2 = int_to_ptr.vmem [resolvable:$true] %s477_s2 }
  0x53   : > { %s4855_s18 = scalar_lea.hbm %s5538_s3, %s4082_s26  ;;  %s4424_s12 = scalar_lea.hbm %s5538_s3, 96 }
  0x54   : > { %s4419_s14 = scalar_lea.hbm %s4855_s18, 48  ;;  %p4425_p1 = scmp.lt.s32.totalorder %s4855_s18, %s5538_s3 }
  0x55   : > { %p4420_p8 = scmp.ne.s32.totalorder %s4855_s18, %s4419_s14  ;;  %p4426_p12 = scmp.lt.s32.totalorder %s4424_s12, %s4419_s14 }
  0x57   : > { %p4422_p10 = pnand %p4420_p8, %p4825_p5  ;;  %p4427_p2 = por %p4426_p12, %p4425_p1 }
  0x59   : > { %p4423_p13 = pneg %p4422_p10 }
  0x5b   : > { %p4428_p3 = pnand %p4427_p2, %p4423_p13 }
  0x5d   : > { %4431 = shalt.err (!%p4428_p3)
}
  0x5e   : > { %s4432_s0 = scalar_lea.vmem %s478_s2, 48  ;;  %s4633_s6 = smov [#allocation9]  }
  0x5f   : > { %p4433_p6 = scmp.ne.s32.totalorder %s478_s2, %s4432_s0  ;;  %s4437_s7 = sshll.u32 %s4633_s6, 4  ;;  %s4438_s7 = int_to_ptr.vmem [resolvable:$false] %s4437_s7 }
  0x60   : > { %s4439_s13 = scalar_lea.vmem %s4438_s7, 96  ;;  %p4440_p4 = scmp.lt.s32.totalorder %s478_s2, %s4438_s7 }
  0x61   : > { %p4435_p7 = pnand %p4433_p6, %p4825_p5  ;;  %p4441_p9 = scmp.lt.s32.totalorder %s4439_s13, %s4432_s0 }
  0x63   : > { %p4436_p11 = pneg %p4435_p7  ;;  %p4442_p8 = por %p4441_p9, %p4440_p4 }
  0x65   : > { %p4443_p10 = pnand %p4442_p8, %p4436_p11 }
  0x67   : > { %4446 = shalt.err (!%p4443_p10)
}
  0x68   : > { %4120 = dma.hbm_to_vmem [thread:$0]  (!%p4793_p0), %s4855_s18, 48, %s478_s2, %s4819_s11  }
  0x69   : > { %s488_s27 = scalar_lea.vmem [#allocation10], %s3694_s15  ;;  %s4447_s14 = scalar_lea.hbm %s4860_s5, 1024 }
  0x6a   : > { %s495_s22 = sshll.u32 %s488_s27, 4  ;;  %p4448_p13 = scmp.ne.s32.totalorder %s4860_s5, %s4447_s14  ;;  %s4881_s22 = int_to_ptr.vmem [resolvable:$true] %s495_s22 }
  0x6b   : > { %s4452_s12 = scalar_lea.hbm %s5495_s4, 2048  ;;  %p4453_p2 = scmp.lt.s32.totalorder %s4860_s5, %s5495_s4 }
  0x6c   : > { %p4450_p1 = pnand %p4448_p13, %p4825_p5  ;;  %p4454_p3 = scmp.lt.s32.totalorder %s4452_s12, %s4447_s14 }
  0x6e   : > { %p4451_p12 = pneg %p4450_p1  ;;  %p4455_p6 = por %p4454_p3, %p4453_p2 }
  0x70   : > { %p4456_p7 = pnand %p4455_p6, %p4451_p12 }
  0x72   : > { %4459 = shalt.err (!%p4456_p7)
}
  0x73   : > { %s4460_s2 = scalar_lea.vmem %s4881_s22, 1024  ;;  %s4634_s15 = smov [#allocation10]  }
  0x74   : > { %p4461_p11 = scmp.ne.s32.totalorder %s4881_s22, %s4460_s2  ;;  %s4465_s18 = sshll.u32 %s4634_s15, 4  ;;  %s4466_s18 = int_to_ptr.vmem [resolvable:$false] %s4465_s18 }
  0x75   : > { %s4467_s0 = scalar_lea.vmem %s4466_s18, 2048  ;;  %p4468_p8 = scmp.lt.s32.totalorder %s4881_s22, %s4466_s18 }
  0x76   : > { %p4463_p4 = pnand %p4461_p11, %p4825_p5  ;;  %p4469_p10 = scmp.lt.s32.totalorder %s4467_s0, %s4460_s2 }
  0x78   : > { %p4464_p9 = pneg %p4463_p4  ;;  %p4470_p13 = por %p4469_p10, %p4468_p8 }
  0x7a   : > { %p4471_p1 = pnand %p4470_p13, %p4464_p9 }
  0x7c   : > { %4474 = shalt.err (!%p4471_p1)
}
  0x7d   : > { %s4635_s6 = smov 64   ;;  %s4636_s7 = smov 4  }
  0x7e   : > { %4123 = dma.hbm_to_vmem [thread:$0]  (!%p4793_p0), %s4860_s5, 1024, %s4881_s22, %s4819_s11, %s4635_s6, %s4635_s6, %s4636_s7  }
  0x7f   : > { %s3697_s13 = sshll.u32 %s4798_s19, 8  ;;  %s3848_s27 = sshll.u32 %s4627_s16, 12 }
  0x80   : > { %s4914_s9 = scalar_lea.hbm %s5499_s8, %s3848_s27  ;;  %s527_s12 = scalar_lea.vmem [#allocation11], %s3697_s13 }
  0x81   : > { %s534_s26 = sshll.u32 %s527_s12, 4  ;;  %s4475_s20 = scalar_lea.hbm %s4914_s9, 4096  ;;  %s4918_s26 = int_to_ptr.vmem [resolvable:$true] %s534_s26 }
  0x82   : > { %p4476_p12 = scmp.ne.s32.totalorder %s4914_s9, %s4475_s20  ;;  %s4480_s2 = scalar_lea.hbm %s5499_s8, 8192 }
  0x83   : > { %p4481_p6 = scmp.lt.s32.totalorder %s4914_s9, %s5499_s8  ;;  %p4482_p7 = scmp.lt.s32.totalorder %s4480_s2, %s4475_s20 }
  0x84   : > { %p4478_p2 = pnand %p4476_p12, %p4825_p5 }
  0x85   : > { %p4483_p11 = por %p4482_p7, %p4481_p6 }
  0x86   : > { %p4479_p3 = pneg %p4478_p2 }
  0x88   : > { %p4484_p4 = pnand %p4483_p11, %p4479_p3 }
  0x8a   : > { %4487 = shalt.err (!%p4484_p4)
}
  0x8b   : > { %s4488_s0 = scalar_lea.vmem %s4918_s26, 4096  ;;  %s4637_s14 = smov [#allocation11]  }
  0x8c   : > { %p4489_p9 = scmp.ne.s32.totalorder %s4918_s26, %s4488_s0  ;;  %s4493_s25 = sshll.u32 %s4637_s14, 4  ;;  %s4494_s25 = int_to_ptr.vmem [resolvable:$false] %s4493_s25 }
  0x8d   : > { %s4495_s12 = scalar_lea.vmem %s4494_s25, 8192  ;;  %p4496_p13 = scmp.lt.s32.totalorder %s4918_s26, %s4494_s25 }
  0x8e   : > { %p4491_p8 = pnand %p4489_p9, %p4825_p5  ;;  %p4497_p1 = scmp.lt.s32.totalorder %s4495_s12, %s4488_s0 }
  0x90   : > { %p4492_p10 = pneg %p4491_p8  ;;  %p4498_p12 = por %p4497_p1, %p4496_p13 }
  0x92   : > { %p4499_p2 = pnand %p4498_p12, %p4492_p10 }
  0x94   : > { %4502 = shalt.err (!%p4499_p2)
}
  0x95   : > { %s4638_s20 = smov 256   ;;  %s4639_s5 = smov 16  }
  0x96   : > { %4126 = dma.hbm_to_vmem [thread:$0]  (!%p4793_p0), %s4914_s9, 4096, %s4918_s26, %s4819_s11, %s4638_s20, %s4638_s20, %s4639_s5  }
  0x97   : > { %s4640_s22 = smov [#allocation6]   ;;  %p5539_p6 = scmp.ne.s32.totalorder %s5533_s28, 0 }
  0x98   : > { %s430_s2 = sshll.u32 %s4640_s22, 4  ;;  %s431_s2 = int_to_ptr.vmem [resolvable:$true] %s430_s2 }
  0x99   : > { %s4514_s15 = scalar_lea.vmem %s431_s2, 256  ;;  %p5540_p7 = pneg %p5539_p6 }
  0x9a   : > { %p4515_p3 = scmp.ne.s32.totalorder %s431_s2, %s4514_s15  ;;  %p4522_p9 = scmp.lt.s32.totalorder %s431_s2, %s431_s2 }
  0x9b   : > { %p4523_p8 = scmp.lt.s32.totalorder %s4514_s15, %s4514_s15 }
  0x9c   : > { %p4517_p11 = pnand %p4515_p3, %p5540_p7 }
  0x9d   : > { %p4524_p10 = por %p4523_p8, %p4522_p9 }
  0x9e   : > { %p4518_p4 = pneg %p4517_p11 }
  0xa0   : > { %p4525_p13 = pnand %p4524_p10, %p4518_p4 }
  0xa2   : > { %4528 = shalt.err (!%p4525_p13)
}
  0xa3   : > { %s4641_s18 = smov 128   ;;  %s4642_s9 = smov 8  }
  0xa4   : > { %s5541_s1 = sld [smem:[#allocation22_spill]]  ;;  %s4954_s12 = scalar_lea.hbm %s5501_s10, %s3848_s27 }
  0xa5   : > { %s555_s20 = scalar_lea.vmem [#allocation12], %s3697_s13  ;;  %s4529_s22 = scalar_lea.hbm %s4954_s12, 4096 }
  0xa6   : > { %s562_s5 = sshll.u32 %s555_s20, 4  ;;  %p4530_p1 = scmp.ne.s32.totalorder %s4954_s12, %s4529_s22  ;;  %s563_s5 = int_to_ptr.vmem [resolvable:$true] %s562_s5 }
  0xa7   : > { %s4534_s16 = scalar_lea.hbm %s5501_s10, 8192  ;;  %p4535_p3 = scmp.lt.s32.totalorder %s4954_s12, %s5501_s10 }
  0xa8   : > { %p4532_p12 = pnand %p4530_p1, %p4825_p5 }
  0xaa   : > { %4113 = dma.hbm_to_vmem [thread:$0]  (!%p5539_p6), %s5541_s1, 256, %s431_s2, [#allocation7], %s4641_s18, %s4641_s18, %s4642_s9  }
  0xab   : > { %p4533_p2 = pneg %p4532_p12  ;;  %p4536_p6 = scmp.lt.s32.totalorder %s4534_s16, %s4529_s22 }
  0xad   : > { %p4537_p7 = por %p4536_p6, %p4535_p3 }
  0xaf   : > { %p4538_p11 = pnand %p4537_p7, %p4533_p2 }
  0xb1   : > { %4541 = shalt.err (!%p4538_p11)
}
  0xb2   : > { %s4542_s19 = scalar_lea.vmem %s563_s5, 4096  ;;  %s4643_s13 = smov [#allocation12]  }
  0xb3   : > { %p4543_p4 = scmp.ne.s32.totalorder %s563_s5, %s4542_s19  ;;  %s4547_s27 = sshll.u32 %s4643_s13, 4  ;;  %s4548_s27 = int_to_ptr.vmem [resolvable:$false] %s4547_s27 }
  0xb4   : > { %s4549_s9 = scalar_lea.vmem %s4548_s27, 8192  ;;  %p4550_p10 = scmp.lt.s32.totalorder %s563_s5, %s4548_s27 }
  0xb5   : > { %p4545_p9 = pnand %p4543_p4, %p4825_p5  ;;  %p4551_p13 = scmp.lt.s32.totalorder %s4549_s9, %s4542_s19 }
  0xb7   : > { %p4546_p8 = pneg %p4545_p9  ;;  %p4552_p1 = por %p4551_p13, %p4550_p10 }
  0xb9   : > { %p4553_p12 = pnand %p4552_p1, %p4546_p8 }
  0xbb   : > { %4556 = shalt.err (!%p4553_p12)
}
  0xbc   : > { %4129 = dma.hbm_to_vmem [thread:$0]  (!%p4793_p0), %s4954_s12, 4096, %s563_s5, %s4819_s11, %s4635_s6, %s4635_s6, %s4636_s7  }
  0xbd   : > { %p5542_p5 = scmp.ne.s32.totalorder %s5532_s24, 0 }
  0xbe   : > { %p5543_p2 = scmp.eq.s32.totalorder (!%p5542_p5), %s4748_s17, 0 }
  0xbf   : > { %592 = sbr.rel (%p5542_p5) target bundleno = 4002 (0xfa2), region = 76 }
  0xc4   : > { %4598 = dma.done.wait (%p5543_p2), [#allocation4], 32   ;;  %p5544_p3 = pmov %p5543_p2 }
  0xc5   : > { %p5545_p6 = pmov %p5543_p2 }
  0xc6   : > { %4600 = vsyncadd (%p5544_p3), [#allocation4], 4294967264 }
  0xc7   : > { %4602 = dma.done.wait (%p5545_p6), [#allocation7], 256   ;;  %p5546_p7 = pmov %p5543_p2 }
  0xc8   : > { %s602_s29 = sand.u32 1, %s4748_s17   ;;  %s604_s11 = sand.u32 1, %s4619_s30  }
  0xc9   : > { %4604 = vsyncadd (%p5546_p7), [#allocation7], 4294967040  ;;  %s4083_s21 = smul.u32 192, %s604_s11  ;;  %s603_s24 = scalar_lea.sflag [#allocation4], %s602_s29 }
  0xca   : > { %p5547_p0 = scmp.ne.s32.totalorder %s5531_s23, 0 }
  0xcb   : > { %s4990_s6 = scalar_lea.vmem [#allocation8], %s4083_s21 }
  0xcc   : > { %4606 = dma.done.wait (%p5547_p0), %s603_s24, 12336  }
  0xcd   : > { %4608 = vsyncadd (%p5547_p0), %s603_s24, 4294954960  ;;  %s4084_s7 = smul.u32 3, %s604_s11  ;;  %s3706_s26 = sshll.u32 %s604_s11, 6 }
  0xce   : > { %s3707_s0 = sshll.u32 %s604_s11, 8  ;;  %p724_p11 = scmp.lt.s32.totalorder %s4748_s17, 1 }
  0xcf   : > { %s5550_s18 = sld [smem:[#allocation27_spill]]  ;;  %s5030_s16 = scalar_lea.vmem [#allocation9], %s4084_s7 }
  0xd0   : > { %s4998_s14 = scalar_select %p724_p11, %s4748_s17, 1 }
  0xd1   : > { %s5551_s29 = sld [smem:[#allocation28_spill]]  ;;  %s5032_s15 = scalar_lea.vmem [#allocation10], %s3706_s26 }
  0xd2   : > { %s3709_s13 = sshll.u32 %s4998_s14, 2  ;;  %s5552_s25 = sld [smem:[#allocation29_spill]] }
  0xd3   : > { %s5553_s23 = sld [smem:[#allocation30_spill]]  ;;  %p5555_p4 = scmp.ne.s32.totalorder %s4748_s17, 0 }
  0xd4   : > { %s5554_s28 = sld [smem:[#allocation31_spill]] }
  0xd5   : > { %s732_s19 = scalar_lea.vmem %s5550_s18, %s4998_s14  ;;  %s5034_s18 = scalar_lea.vmem [#allocation11], %s3707_s0 }
  0xd6   : > { %750 = sbr.rel (%p5555_p4) target bundleno = 221 (0xdd), region = 108 }
  0xd7   : > { %s5016_s11 = scalar_lea.vmem %s5551_s29, %s3709_s13  ;;  %s5036_s13 = scalar_lea.vmem [#allocation12], %s3707_s0 }
  0xd8   : > { %s739_s12 = scalar_lea.vmem %s5552_s25, %s4998_s14 }
  0xd9   : > { %s742_s3 = scalar_lea.vmem %s5553_s23, %s4998_s14 }
  0xda   : > { %s745_s2 = scalar_lea.vmem %s5554_s28, %s4998_s14 }
  0xdb   : > { %v751_v0 = vld [vmem:[#allocation6] sm:$0xff]  ;;  %v752_v1 = vld [vmem:[#allocation6 + $0x8] sm:$0xff] }
  0xdc   : > { %753 = vst [vmem:[#allocation2] sm:$0xff] %v751_v0  ;;  %754 = vst [vmem:[#allocation2 + $0x8] sm:$0xff] %v752_v1 }
  0xdd PF: > { %v4189_v2 = vld [vmem:[%s4990_s6 + $0xac] ss:$12 sps:$4 sm:$0xff]   ;;  %v4191_v3 = vld [vmem:[%s4990_s6 + $0xa8] ss:$12 sps:$4 sm:$0xff]   ;;  %v4644_v4 = vmov 0   ;;  %v4645_v5 = vmov 0.0   ;;  %v770_v31 = vlaneseq }
  0xde   : > { %995 = vmatprep.mubr.bf16.mxu0 %v4644_v4  ;;  %3947 = vmatprep.subr.bf16.mxu1 %v4645_v5  ;;  %v4192_v6 = vld [vmem:[%s4990_s6 + $0x94] ss:$12 sps:$4 sm:$0xff]   ;;  %v4194_v7 = vld [vmem:[%s4990_s6 + $0x90] ss:$12 sps:$4 sm:$0xff]   ;;  %v4197_v9 = vld [vmem:[%s4990_s6 + $0x78] ss:$12 sps:$4 sm:$0xff]  }
  0xdf   : > { %963 = vmatprep.subr.bf16.mxu0 %v4189_v2  ;;  %v4195_v8 = vld [vmem:[%s4990_s6 + $0x7c] ss:$12 sps:$4 sm:$0xff]   ;;  %v4198_v10 = vld [vmem:[%s4990_s6 + $0x64] ss:$12 sps:$4 sm:$0xff]   ;;  %v4200_v11 = vld [vmem:[%s4990_s6 + $0x60] ss:$12 sps:$4 sm:$0xff]  }
  0xe0   : > { %964 = vmatpush1.bf16.msra.mxu0 %v4191_v3  ;;  %v4201_v12 = vld [vmem:[%s4990_s6 + $0x4c] ss:$12 sps:$4 sm:$0xff]   ;;  %v4213_v13 = vld [vmem:[%s4990_s6 + $0xb0] ss:$12 sps:$4 sm:$0xff]   ;;  %v4203_v15 = vld [vmem:[%s4990_s6 + $0x48] ss:$12 sps:$4 sm:$0xff]  }
  0xe1   : > { %965 = vmatprep.subr.bf16.mxu0 %v4192_v6  ;;  %3948 = vmatpush3.bf16.msra.mxu1 %v4213_v13  ;;  %v4214_v14 = vld [vmem:[%s4990_s6 + $0x98] ss:$12 sps:$4 sm:$0xff]   ;;  %v4204_v16 = vld [vmem:[%s4990_s6 + $0x34] ss:$12 sps:$4 sm:$0xff]   ;;  %v4206_v18 = vld [vmem:[%s4990_s6 + $0x30] ss:$12 sps:$4 sm:$0xff]  }
  0xe2   : > { %3949 = vmatprep.subr.bf16.mxu1 %v4645_v5  ;;  %v4215_v17 = vld [vmem:[%s4990_s6 + $0x80] ss:$12 sps:$4 sm:$0xff]   ;;  %v4207_v19 = vld [vmem:[%s4990_s6 + $0x1c] ss:$12 sps:$4 sm:$0xff]   ;;  %v4209_v21 = vld [vmem:[%s4990_s6 + $0x18] ss:$12 sps:$4 sm:$0xff]  }
  0xe3   : > { %v4216_v20 = vld [vmem:[%s4990_s6 + $0x68] ss:$12 sps:$4 sm:$0xff]   ;;  %v4210_v22 = vld [vmem:[%s4990_s6 + $0x4] ss:$12 sps:$4 sm:$0xff]   ;;  %v4212_v24 = vld [vmem:[%s4990_s6] ss:$12 sps:$4 sm:$0xff]  }
  0xe4   : > { %966 = vmatpush1.bf16.msra.mxu0 %v4194_v7  ;;  %v4217_v23 = vld [vmem:[%s4990_s6 + $0x50] ss:$12 sps:$4 sm:$0xff]   ;;  %v5068_v26 = vld [vmem:[#allocation2 + $0x8] sm:$0xff]  ;;  %vm4646_vm0 = vmmov 0   ;;  %v5087_v32 = vshrl.u32 %v770_v31, 7  ;;  %vm1063_vm1 = vcmask 261120  }
  0xe5   : > { %967 = vmatprep.subr.bf16.mxu0 %v4195_v8  ;;  %3950 = vmatpush3.bf16.msra.mxu1 %v4214_v14  ;;  %v5066_v25 = vld [vmem:[#allocation2] sm:$0xff]  ;;  %v4220_v30 = vld [vmem:[%s4990_s6 + $0x8] ss:$12 sps:$4 sm:$0xff]   ;;  %s4647_s1 = smov 96   ;;  %v4648_v54 = vmov 1966171168  }
  0xe6   : > { %3951 = vmatprep.subr.bf16.mxu1 %v4645_v5  ;;  %v4218_v27 = vld [vmem:[%s4990_s6 + $0x38] ss:$12 sps:$4 sm:$0xff]   ;;  %v785_v28 = vpack.c.bf16 %v5068_v26, %v5066_v25  ;;  %v4219_v29 = vld [vmem:[%s4990_s6 + $0x20] ss:$12 sps:$4 sm:$0xff]   ;;  %3963 = vmatprep.mubr.msk.bf16.mxu1 %vm4646_vm0, %v4645_v5  ;;  %v826_v33 = vsub.s32 1, %v5087_v32  ;;  %v5092_v35 = vsub.s32 0, %v5087_v32  ;;  %v768_v55 = vunpack.c.l.s4 %v4648_v54 }
  0xe7   : > { %v818_v34 = vld [vmem:[%s5030_s16] sm:$0x7]  ;;  %v830_v46 = vsub.s32 2, %v5087_v32  ;;  %vm1232_vm5 = vcmask 64512   ;;  %s4649_s6 = smov 64   ;;  %s4650_s7 = smov 32  }
  0xe8   : > { %968 = vmatpush1.bf16.msra.mxu0 %v4197_v9  ;;  %v827_v36 = vrot.slane %v818_v34, %v826_v33  ;;  %v823_v38 = vrot.slane %v818_v34, %v5092_v35  ;;  %v769_v56 = vunpack.c.0.s8 %v768_v55  ;;  %v3711_v58 = vld.sshfl [vmem:[#allocation3] sm:$0x11 pattern:$0x75316420]  ;;  %s5560_s23 = sld [smem:[#allocation25_spill]]  ;;  %p3842_p9 = scmp.ne.s32.totalorder %s4748_s17, 1 }
  0xe9   : > { %969 = vmatprep.subr.bf16.mxu0 %v4198_v10  ;;  %3952 = vmatpush3.bf16.msra.mxu1 %v4215_v17  ;;  %v831_v47 = vrot.slane %v818_v34, %v830_v46  ;;  %v766_v59 = vcombine.high %v3711_v58, %v3711_v58  ;;  %v4225_v2 = vld [vmem:[%s5032_s15 + $0x28] sm:$0xff]   ;;  %s5562_s21 = sld [smem:[#allocation26_spill]] }
  0xea   : > { %3953 = vmatprep.subr.bf16.mxu1 %v4645_v5  ;;  %v772_v57 = vsub.s32 %v769_v56, %v5087_v32 }
  0xec   : > { %970 = vmatpush1.bf16.msra.mxu0 %v4200_v11  ;;  %v773_v60 = vrot.slane %v3711_v58, %v772_v57  ;;  %v780_v61 = vrot.slane %v766_v59, %v772_v57 }
  0xed   : > { %971 = vmatprep.subr.bf16.mxu0 %v4201_v12  ;;  %3954 = vmatpush3.bf16.msra.mxu1 %v4216_v20 }
  0xee   : > { %3955 = vmatprep.subr.bf16.mxu1 %v4645_v5  ;;  %vm783_vm2 = vcmp.gt.f32.partialorder %v773_v60, 0.0  ;;  %vm784_vm3 = vcmp.gt.f32.partialorder %v780_v61, 0.0  ;;  %s5561_s27 = scalar_lea.vmem %s5560_s23, %s4998_s14 }
  0xef   : > { %v1218_v62 = vsel %vm783_vm2, 1, %v4644_v4  ;;  %v1219_v0 = vsel %vm784_vm3, 1, %v4644_v4  ;;  %s5563_s24 = scalar_lea.vmem %s5562_s21, %s4998_s14 }
  0xf0   : > { %972 = vmatpush1.bf16.msra.mxu0 %v4203_v15  ;;  %v1223_v63 = vrot.slane %v1218_v62, %v5092_v35  ;;  %v1227_v3 = vrot.slane %v1219_v0, %v5092_v35 }
  0xf1   : > { %973 = vmatprep.subr.bf16.mxu0 %v4204_v16  ;;  %3956 = vmatpush3.bf16.msra.mxu1 %v4217_v23 }
  0xf2   : > { %3957 = vmatprep.subr.bf16.mxu1 %v4645_v5  ;;  %vm5138_vm4 = vcmp.eq.s32.totalorder %v1223_v63, 1  ;;  %vm5146_vm6 = vcmp.eq.s32.totalorder %v1227_v3, 1 }
  0xf4   : > { %974 = vmatpush1.bf16.msra.mxu0 %v4206_v18 }
  0xf5   : > { %975 = vmatprep.subr.bf16.mxu0 %v4207_v19  ;;  %3958 = vmatpush3.bf16.msra.mxu1 %v4218_v27 }
  0xf6   : > { %3959 = vmatprep.subr.bf16.mxu1 %v4645_v5 }
  0xf8   : > { %976 = vmatpush1.bf16.msra.mxu0 %v4209_v21 }
  0xf9   : > { %977 = vmatprep.subr.bf16.mxu0 %v4210_v22  ;;  %3960 = vmatpush3.bf16.msra.mxu1 %v4219_v29 }
  0xfa   : > { %3961 = vmatprep.subr.bf16.mxu1 %v4645_v5 }
  0xfc   : > { %978 = vmatpush1.bf16.msra.mxu0 %v4212_v24 }
  0xfd   : > { %3967 = vmatprep.subr.mxu0 %v4645_v5  ;;  %3962 = vmatpush3.bf16.msra.mxu1 %v4220_v30 }
  0xfe   : > { %3972 = vmatprep.subr.mxu1 %v4645_v5 }
  0xff   : > { %996 = vmatmul.mubr.bf16.vlgmr.msra.gmra.mxu0 %v785_v28 }
 0x100   : > { %3969 = vmatprep.mubr.msk.f32.mxu0 %vm4646_vm0, %v4645_v5  ;;  %3964 = vmatmul.mubr.bf16.vlgmr.msra.gmra.mxu1 %v785_v28 }
 0x101   : > { %3974 = vmatprep.mubr.msk.f32.mxu1 %vm4646_vm0, %v4645_v5 }
 0x1bf   : > { %v997_v37 = vpop.f32.mrf.mxu0 }
 0x1c0   : > { %v5101_v42 = vadd.f32 %v997_v37, %v823_v38  ;;  %v1040_v48 = vpop.f32.mrf.mxu1 }
 0x1c1   : > { %v999_v39 = vpop.f32.mrf.mxu0  ;;  %v5126_v49 = vadd.f32 %v1040_v48, %v831_v47 }
 0x1c2   : > { %v5097_v40 = vadd.f32 %v999_v39, %v827_v36  ;;  %v3965_v50 = vpop.f32.mrf.mxu1 }
 0x1c3   : > { %v1001_v41 = vpop.f32.mrf.mxu0 }
 0x1c4   : > { %3968 = vmatpush3.xpose.msk.msra.mxu0 %vm1063_vm1, %v5097_v40  ;;  %v5112_v45 = vadd.f32 %v1001_v41, %v823_v38  ;;  %v1043_v51 = vpop.f32.mrf.mxu1 }
 0x1c5   : > { %v1003_v43 = vpop.f32.mrf.mxu0  ;;  %3977 = vmatprep.subr.mxu0 %v4645_v5  ;;  %v5130_v52 = vadd.f32 %v1043_v51, %v831_v47 }
 0x1c6   : > { %v5104_v44 = vadd.f32 %v1003_v43, %v827_v36  ;;  %v3966_v53 = vpop.f32.mrf.mxu1 }
 0x1c7   : > { %3970 = vmatmul.mubr.msk.f32.vlgmr.msra.gmra.mxu0 %vm1063_vm1, %v5101_v42 }
 0x1c8   : > { %1482 = vrot.lane.b32.xlu1 %v5104_v44, %s4647_s1  ;;  %3973 = vmatpush3.xpose.msk.msra.mxu1 %vm1063_vm1, %v5104_v44 }
 0x1c9   : > { %3982 = vmatprep.subr.mxu1 %v4645_v5  ;;  %3979 = vmatprep.mubr.msk.f32.mxu0 %vm4646_vm0, %v4645_v5 }
 0x1ca   : > { %3978 = vmatpush3.msra.mxu0 %v5126_v49 }
 0x1cb   : > { %3975 = vmatmul.mubr.msk.f32.vlgmr.msra.gmra.mxu1 %vm1063_vm1, %v5112_v45  ;;  %3987 = vmatprep.subr.mxu0 %v4645_v5 }
 0x1cc   : > { %1402 = vrot.lane.b32.xlu1 %v5101_v42, %s4647_s1  ;;  %3984 = vmatprep.mubr.msk.f32.mxu1 %vm4646_vm0, %v4645_v5 }
 0x1cd   : > { %3983 = vmatpush3.msra.mxu1 %v5130_v52 }
 0x1ce   : > { %3992 = vmatprep.subr.mxu1 %v4645_v5 }
 0x23a   : > { %v1483_v28 = vpop.permute.xlu1 %1482 }
 0x23e   : > { %v1403_v29 = vpop.permute.xlu1 %1402 }
 0x287   : > { %v1136_v1 = vpop.f32.mrf.mxu0 }
 0x288   : > { %v1216_v6 = vmul.f32 0.17677669, %v1136_v1 }
 0x289   : > { %v3971_v7 = vpop.f32.mrf.mxu0 }
 0x28a   : > { %v1230_v8 = vsel %vm5138_vm4, %v1216_v6, -1e+09 }
 0x28b   : > { %v1212_v9 = vpop.f32.mrf.mxu1  ;;  %v1233_v10 = vsel %vm1232_vm5, %v1230_v8, -inf }
 0x28c   : > { %v1217_v12 = vmul.f32 0.17677669, %v1212_v9  ;;  %1234 = vmax.xlane.f32.xlu0 %v1233_v10 }
 0x28d   : > { %v3976_v13 = vpop.f32.mrf.mxu1 }
 0x28e   : > { %v1231_v14 = vsel %vm5146_vm6, %v1217_v12, -1e+09 }
 0x28f   : > { %v1236_v15 = vsel %vm1232_vm5, %v1231_v14, -inf }
 0x290   : > { %1237 = vmax.xlane.f32.xlu0 %v1236_v15 }
 0x2a6   : > { %1404 = vrot.lane.b32.xlu0 %v5097_v40, %s4647_s1 }
 0x315   : > { %v1235_v16 = vpop.xlane.xlu0 %1234 }
 0x316   : > { %v1239_v17 = vsub.f32 %v1230_v8, %v1235_v16 }
 0x318   : > { %v1241_v18 = vmul.f32 1.442695, %v1239_v17 }
 0x319   : > { %v1238_v19 = vpop.xlane.xlu0 %1237 }
 0x31a   : > { %4309 = vpow2.f32 %v1241_v18  ;;  %v1240_v20 = vsub.f32 %v1231_v14, %v1238_v19  ;;  %v4223_v18 = vld [vmem:[%s5032_s15 + $0x18] sm:$0xff]  }
 0x31c   : > { %v1243_v21 = vmul.f32 1.442695, %v1240_v20 }
 0x31d   : > { %v1405_v37 = vpop.permute.xlu0 %1404 }
 0x31e   : > { %4311 = vpow2.f32 %v1243_v21  ;;  %v4221_v21 = vld [vmem:[%s5032_s15 + $0x8] sm:$0xff]  }
 0x327   : > { %v4310_v22 = vpop.eup %4309 }
 0x328   : > { %v1245_v23 = vsel %vm1232_vm5, %v4310_v22, 0.0 }
 0x329   : > { %1246 = vadd.xlane.f32.xlu1 %v1245_v23 }
 0x32b   : > { %v4312_v24 = vpop.eup %4311 }
 0x32c   : > { %v1248_v27 = vsel %vm1232_vm5, %v4312_v24, 0.0 }
 0x32d   : > { %1249 = vadd.xlane.f32.xlu1 %v1248_v27  ;;  %v4224_v27 = vld [vmem:[%s5032_s15 + $0x10] sm:$0xff]  }
 0x33e   : > { %1480 = vrot.lane.b32.xlu1 %v5112_v45, %s4647_s1 }
 0x3b2   : > { %v1247_v30 = vpop.xlane.xlu1 %1246 }
 0x3b3   : > { %4313 = vrcp.f32 %v1247_v30 }
 0x3b6   : > { %v1250_v31 = vpop.xlane.xlu1 %1249 }
 0x3b7   : > { %4315 = vrcp.f32 %v1250_v31 }
 0x3ba   : > { %v1481_v41 = vpop.permute.xlu1 %1480 }
 0x3c0   : > { %v4314_v34 = vpop.eup %4313 }
 0x3c1   : > { %v1253_v36 = vmul.f32 %v4314_v34, %v4310_v22  ;;  %v4222_v22 = vld [vmem:[%s5032_s15] sm:$0xff]  }
 0x3c3   : > { %3980 = vmatmul.mubr.msk.f32.vlgmr.msra.gmra.mxu0 %vm1232_vm5, %v1253_v36 }
 0x3c4   : > { %v4316_v38 = vpop.eup %4315  ;;  %3988 = vmatpush3.xpose.msk.msra.mxu0 %vm1063_vm1, %v1405_v37  ;;  %3989 = vmatprep.mubr.msk.f32.mxu0 %vm4646_vm0, %v4645_v5 }
 0x3c5   : > { %v1254_v39 = vmul.f32 %v4316_v38, %v4312_v24  ;;  %3997 = vmatprep.subr.mxu0 %v4645_v5 }
 0x3c7   : > { %3985 = vmatmul.mubr.msk.f32.vlgmr.msra.gmra.mxu1 %vm1232_vm5, %v1254_v39  ;;  %3990 = vmatmul.mubr.msk.f32.vlgmr.msra.gmra.mxu0 %vm1063_vm1, %v1403_v29 }
 0x3c8   : > { %3993 = vmatpush3.xpose.msk.msra.mxu1 %vm1063_vm1, %v1483_v28  ;;  %3994 = vmatprep.mubr.msk.f32.mxu1 %vm4646_vm0, %v4645_v5 }
 0x3c9   : > { %4002 = vmatprep.subr.mxu1 %v4645_v5  ;;  %3999 = vmatprep.mubr.msk.f32.mxu0 %vm4646_vm0, %v4645_v5 }
 0x3cb   : > { %3995 = vmatmul.mubr.msk.f32.vlgmr.msra.gmra.mxu1 %vm1063_vm1, %v1481_v41 }
 0x3cc   : > { %4004 = vmatprep.mubr.msk.f32.mxu1 %vm4646_vm0, %v4645_v5 }
 0x483   : > { %v5175_v43 = vpop.f32.mrf.mxu0 }
 0x485   : > { %v3981_v47 = vpop.f32.mrf.mxu0 }
 0x487   : > { %v5177_v48 = vpop.f32.mrf.mxu1  ;;  %v1476_v50 = vpop.f32.mrf.mxu0 }
 0x488   : > { %v1401_v51 = vpack.c.bf16 %v5177_v48, %v5175_v43  ;;  %v1558_v53 = vmul.f32 0.17677669, %v1476_v50 }
 0x489   : > { %v3986_v54 = vpop.f32.mrf.mxu1  ;;  %v3991_v55 = vpop.f32.mrf.mxu0 }
 0x48a   : > { %v1560_v56 = vsel %vm5138_vm4, %v1558_v53, -1e+09 }
 0x48b   : > { %v1554_v57 = vpop.f32.mrf.mxu1  ;;  %v1562_v58 = vsel %vm1232_vm5, %v1560_v56, -inf }
 0x48c   : > { %v1559_v59 = vmul.f32 0.17677669, %v1554_v57  ;;  %1563 = vmax.xlane.f32.xlu0 %v1562_v58 }
 0x48d   : > { %v3996_v60 = vpop.f32.mrf.mxu1 }
 0x48e   : > { %v1561_v61 = vsel %vm5146_vm6, %v1559_v59, -1e+09 }
 0x48f   : > { %v1565_v62 = vsel %vm1232_vm5, %v1561_v61, -inf }
 0x490   : > { %1566 = vmax.xlane.f32.xlu1 %v1565_v62 }
 0x4a1   : > { %1662 = vrot.lane.b32.xlu1 %v5130_v52, %s4647_s1 }
 0x4a5   : > { %1931 = vrot.lane.b32.xlu1 %v5104_v44, %s4649_s6 }
 0x4a9   : > { %1929 = vrot.lane.b32.xlu1 %v5112_v45, %s4649_s6 }
 0x4ad   : > { %1851 = vrot.lane.b32.xlu1 %v5101_v42, %s4649_s6 }
 0x4b1   : > { %2246 = vrot.lane.b32.xlu1 %v5097_v40, %s4650_s7 }
 0x515   : > { %v1564_v63 = vpop.xlane.xlu0 %1563 }
 0x516   : > { %v1568_v0 = vsub.f32 %v1560_v56, %v1564_v63 }
 0x518   : > { %v1570_v1 = vmul.f32 1.442695, %v1568_v0 }
 0x519   : > { %v1567_v3 = vpop.xlane.xlu1 %1566 }
 0x51a   : > { %4317 = vpow2.f32 %v1570_v1  ;;  %v1569_v6 = vsub.f32 %v1561_v61, %v1567_v3 }
 0x51c   : > { %v1572_v7 = vmul.f32 1.442695, %v1569_v6 }
 0x51d   : > { %v1663_v8 = vpop.permute.xlu1 %1662 }
 0x51e   : > { %4319 = vpow2.f32 %v1572_v7  ;;  %4003 = vmatpush3.msra.mxu1 %v1663_v8 }
 0x51f   : > { %4015 = vmatprep.subr.bf16.mxu1 %v4645_v5 }
 0x521   : > { %v1932_v23 = vpop.permute.xlu1 %1931 }
 0x525   : > { %v1930_v24 = vpop.permute.xlu1 %1929 }
 0x527   : > { %v4318_v9 = vpop.eup %4317 }
 0x528   : > { %v1574_v10 = vsel %vm1232_vm5, %v4318_v9, 0.0 }
 0x529   : > { %1575 = vadd.xlane.f32.xlu0 %v1574_v10  ;;  %v1852_v38 = vpop.permute.xlu1 %1851 }
 0x52b   : > { %v4320_v12 = vpop.eup %4319 }
 0x52c   : > { %v1577_v13 = vsel %vm1232_vm5, %v4320_v12, 0.0 }
 0x52d   : > { %1578 = vadd.xlane.f32.xlu0 %v1577_v13  ;;  %v2247_v6 = vpop.permute.xlu1 %2246 }
 0x543   : > { %1585 = vrot.lane.b32.xlu0 %v5126_v49, %s4647_s1 }
 0x547   : > { %1853 = vrot.lane.b32.xlu0 %v5097_v40, %s4649_s6 }
 0x5b2   : > { %v1576_v14 = vpop.xlane.xlu0 %1575 }
 0x5b3   : > { %4321 = vrcp.f32 %v1576_v14 }
 0x5b6   : > { %v1579_v15 = vpop.xlane.xlu0 %1578 }
 0x5b7   : > { %4323 = vrcp.f32 %v1579_v15 }
 0x5ba   : > { %v1586_v16 = vpop.permute.xlu0 %1585 }
 0x5bb   : > { %3998 = vmatpush3.msra.mxu0 %v1586_v16 }
 0x5bc   : > { %4007 = vmatprep.subr.bf16.mxu0 %v4645_v5 }
 0x5be   : > { %v1854_v36 = vpop.permute.xlu0 %1853 }
 0x5c0   : > { %v4322_v17 = vpop.eup %4321 }
 0x5c1   : > { %v1582_v19 = vmul.f32 %v4322_v17, %v4318_v9 }
 0x5c3   : > { %4000 = vmatmul.mubr.msk.f32.vlgmr.msra.gmra.mxu0 %vm1232_vm5, %v1582_v19 }
 0x5c4   : > { %v4324_v20 = vpop.eup %4323  ;;  %4008 = vmatpush3.bf16.msra.mxu0 %v4223_v18  ;;  %4011 = vmatprep.mubr.msk.bf16.mxu0 %vm4646_vm0, %v4645_v5 }
 0x5c5   : > { %v1583_v40 = vmul.f32 %v4324_v20, %v4320_v12  ;;  %4009 = vmatprep.subr.bf16.mxu0 %v4645_v5 }
 0x5c7   : > { %4005 = vmatmul.mubr.msk.f32.vlgmr.msra.gmra.mxu1 %vm1232_vm5, %v1583_v40 }
 0x5c8   : > { %4016 = vmatpush3.bf16.msra.mxu1 %v4221_v21  ;;  %4019 = vmatprep.mubr.msk.bf16.mxu1 %vm4646_vm0, %v4645_v5 }
 0x5c9   : > { %4017 = vmatprep.subr.bf16.mxu1 %v4645_v5  ;;  %4010 = vmatpush3.bf16.msra.mxu0 %v4224_v27 }
 0x5ca   : > { %4023 = vmatprep.subr.mxu0 %v4645_v5 }
 0x5cc   : > { %4018 = vmatpush3.bf16.msra.mxu1 %v4222_v22 }
 0x5cd   : > { %4028 = vmatprep.subr.mxu1 %v4645_v5 }
 0x5cf   : > { %4020 = vmatmul.mubr.msk.bf16.vlgmr.msra.gmra.mxu1 %vm1063_vm1, %v1401_v51 }
 0x5d0   : > { %4029 = vmatpush3.xpose.msk.msra.mxu1 %vm1063_vm1, %v1932_v23  ;;  %4030 = vmatprep.mubr.msk.f32.mxu1 %vm4646_vm0, %v4645_v5 }
 0x5d1   : > { %4038 = vmatprep.subr.mxu1 %v4645_v5 }
 0x5d7   : > { %4031 = vmatmul.mubr.msk.f32.vlgmr.msra.gmra.mxu1 %vm1063_vm1, %v1930_v24 }
 0x5d8   : > { %4040 = vmatprep.mubr.msk.f32.mxu1 %vm4646_vm0, %v4645_v5 }
 0x683   : > { %v1657_v28 = vpop.f32.mrf.mxu0 }
 0x685   : > { %v4001_v29 = vpop.f32.mrf.mxu0 }
 0x687   : > { %v1734_v30 = vpop.f32.mrf.mxu1 }
 0x688   : > { %v1738_v31 = vpack.c.bf16 %v1734_v30, %v1657_v28 }
 0x689   : > { %v4006_v34 = vpop.f32.mrf.mxu1 }
 0x68a   : > { %4012 = vmatmul.mubr.msk.bf16.vlgmr.msra.gmra.mxu0 %vm1063_vm1, %v1738_v31 }
 0x68b   : > { %4024 = vmatpush3.xpose.msk.msra.mxu0 %vm1063_vm1, %v1854_v36  ;;  %4025 = vmatprep.mubr.msk.f32.mxu0 %vm4646_vm0, %v4645_v5 }
 0x68c   : > { %4033 = vmatprep.subr.mxu0 %v4645_v5 }
 0x68f   : > { %v5235_v37 = vpop.f32.mrf.mxu1 }
 0x691   : > { %v4021_v39 = vpop.f32.mrf.mxu1 }
 0x692   : > { %4026 = vmatmul.mubr.msk.f32.vlgmr.msra.gmra.mxu0 %vm1063_vm1, %v1852_v38  ;;  %v4226_v38 = vld [vmem:[%s5032_s15 + $0x20] sm:$0xff]  }
 0x693   : > { %v5238_v41 = vpop.f32.mrf.mxu1  ;;  %4035 = vmatprep.mubr.msk.f32.mxu0 %vm4646_vm0, %v4645_v5 }
 0x695   : > { %v4022_v43 = vpop.f32.mrf.mxu1 }
 0x697   : > { %v2003_v47 = vpop.f32.mrf.mxu1 }
 0x698   : > { %v2008_v48 = vmul.f32 0.17677669, %v2003_v47 }
 0x699   : > { %v4032_v50 = vpop.f32.mrf.mxu1 }
 0x69a   : > { %v2010_v51 = vsel %vm5146_vm6, %v2008_v48, -1e+09 }
 0x69b   : > { %v2014_v53 = vsel %vm1232_vm5, %v2010_v51, -inf }
 0x69c   : > { %2015 = vmax.xlane.f32.xlu0 %v2014_v53 }
 0x6b2   : > { %2109 = vrot.lane.b32.xlu0 %v5130_v52, %s4649_s6 }
 0x6b6   : > { %2244 = vrot.lane.b32.xlu0 %v5101_v42, %s4650_s7 }
 0x6ba   : > { %2322 = vrot.lane.b32.xlu0 %v5112_v45, %s4650_s7 }
 0x725   : > { %v2016_v54 = vpop.xlane.xlu0 %2015 }
 0x726   : > { %v2018_v55 = vsub.f32 %v2010_v51, %v2016_v54 }
 0x728   : > { %v2021_v56 = vmul.f32 1.442695, %v2018_v55 }
 0x729   : > { %v2110_v57 = vpop.permute.xlu0 %2109 }
 0x72a   : > { %4325 = vpow2.f32 %v2021_v56  ;;  %4039 = vmatpush3.msra.mxu1 %v2110_v57 }
 0x72b   : > { %4051 = vmatprep.subr.mxu1 %v4645_v5 }
 0x72d   : > { %v2245_v9 = vpop.permute.xlu0 %2244 }
 0x731   : > { %v2323_v12 = vpop.permute.xlu0 %2322 }
 0x737   : > { %v4326_v58 = vpop.eup %4325 }
 0x738   : > { %v2026_v59 = vsel %vm1232_vm5, %v4326_v58, 0.0 }
 0x739   : > { %2027 = vadd.xlane.f32.xlu1 %v2026_v59 }
 0x74a   : > { %2324 = vrot.lane.b32.xlu1 %v5104_v44, %s4650_s7  ;;  %v5255_v60 = vpop.f32.mrf.mxu0 }
 0x74c   : > { %v4013_v42 = vpop.f32.mrf.mxu0 }
 0x74e   : > { %v5257_v61 = vpop.f32.mrf.mxu0 }
 0x750   : > { %v4014_v45 = vpop.f32.mrf.mxu0 }
 0x752   : > { %v1925_v62 = vpop.f32.mrf.mxu0 }
 0x753   : > { %v2007_v0 = vmul.f32 0.17677669, %v1925_v62 }
 0x754   : > { %v4027_v63 = vpop.f32.mrf.mxu0 }
 0x755   : > { %v2009_v1 = vsel %vm5138_vm4, %v2007_v0, -1e+09 }
 0x756   : > { %v2011_v3 = vsel %vm1232_vm5, %v2009_v1, -inf }
 0x76e   : > { %2012 = vmax.xlane.f32.xlu1 %v2011_v3  ;;  %v4227_v3 = vld [vmem:[%s5032_s15 + $0x38] sm:$0xff]  }
 0x7c2   : > { %v2028_v7 = vpop.xlane.xlu1 %2027 }
 0x7c3   : > { %4327 = vrcp.f32 %v2028_v7  ;;  %v1845_v7 = vadd.f32 %v5235_v37, %v5255_v60 }
 0x7c6   : > { %v2325_v10 = vpop.permute.xlu1 %2324 }
 0x7d0   : > { %v4328_v8 = vpop.eup %4327 }
 0x7d1   : > { %v2032_v44 = vmul.f32 %v4328_v8, %v4326_v58 }
 0x7d3   : > { %4041 = vmatmul.mubr.msk.f32.vlgmr.msra.gmra.mxu1 %vm1232_vm5, %v2032_v44 }
 0x7d4   : > { %4052 = vmatpush3.xpose.msk.msra.mxu1 %vm1063_vm1, %v2247_v6  ;;  %4053 = vmatprep.mubr.msk.f32.mxu1 %vm4646_vm0, %v4645_v5  ;;  %v4228_v6 = vld [vmem:[%s5032_s15 + $0x30] sm:$0xff]  }
 0x7d5   : > { %4056 = vmatprep.subr.mxu1 %v4645_v5 }
 0x7d7   : > { %4054 = vmatmul.mubr.msk.f32.vlgmr.msra.gmra.mxu1 %vm1063_vm1, %v2245_v9 }
 0x7d8   : > { %4057 = vmatpush3.xpose.msk.msra.mxu1 %vm1063_vm1, %v2325_v10  ;;  %4058 = vmatprep.mubr.msk.f32.mxu1 %vm4646_vm0, %v4645_v5  ;;  %v1848_v10 = vadd.f32 %v5238_v41, %v5257_v61  ;;  %v3772_v41 = vld [vmem:[%s5561_s27] ss:$0 sm:$0xff] }
 0x7d9   : > { %4061 = vmatprep.subr.mxu1 %v4645_v5 }
 0x7db   : > { %4059 = vmatmul.mubr.msk.f32.vlgmr.msra.gmra.mxu1 %vm1063_vm1, %v2323_v12 }
 0x7dc   : > { %4063 = vmatprep.mubr.msk.f32.mxu1 %vm4646_vm0, %v4645_v5 }
 0x7f7   : > { %v2013_v13 = vpop.xlane.xlu1 %2012 }
 0x7f8   : > { %v2017_v14 = vsub.f32 %v2009_v1, %v2013_v13 }
 0x7fa   : > { %v2019_v15 = vmul.f32 1.442695, %v2017_v14 }
 0x7fc   : > { %4329 = vpow2.f32 %v2019_v15 }
 0x809   : > { %v4330_v16 = vpop.eup %4329 }
 0x80a   : > { %v2023_v17 = vsel %vm1232_vm5, %v4330_v16, 0.0 }
 0x80b   : > { %2024 = vadd.xlane.f32.xlu0 %v2023_v17 }
 0x821   : > { %2033 = vrot.lane.b32.xlu0 %v5126_v49, %s4649_s6 }
 0x825   : > { %2502 = vrot.lane.b32.xlu0 %v5130_v52, %s4650_s7 }
 0x893   : > { %v2181_v18 = vpop.f32.mrf.mxu1 }
 0x894   : > { %v2025_v19 = vpop.xlane.xlu0 %2024 }
 0x895   : > { %4331 = vrcp.f32 %v2025_v19  ;;  %v4042_v20 = vpop.f32.mrf.mxu1 }
 0x897   : > { %v2318_v21 = vpop.f32.mrf.mxu1 }
 0x898   : > { %v2400_v40 = vmul.f32 0.17677669, %v2318_v21  ;;  %v2034_v22 = vpop.permute.xlu0 %2033 }
 0x899   : > { %4034 = vmatpush3.msra.mxu0 %v2034_v22  ;;  %v4055_v23 = vpop.f32.mrf.mxu1 }
 0x89a   : > { %v2402_v24 = vsel %vm5138_vm4, %v2400_v40, -1e+09  ;;  %4043 = vmatprep.subr.bf16.mxu0 %v4645_v5 }
 0x89b   : > { %v2396_v27 = vpop.f32.mrf.mxu1  ;;  %v2404_v28 = vsel %vm1232_vm5, %v2402_v24, -inf }
 0x89c   : > { %v2401_v52 = vmul.f32 0.17677669, %v2396_v27  ;;  %2405 = vmax.xlane.f32.xlu1 %v2404_v28  ;;  %v2503_v59 = vpop.permute.xlu0 %2502  ;;  %v4231_v27 = vld [vmem:[%s5034_s18 + $0xe4] ss:$16 sps:$4 sm:$0xff]   ;;  %v4232_v28 = vld [vmem:[%s5034_s18 + $0xe8] ss:$16 sps:$4 sm:$0xff]  }
 0x89d   : > { %v4060_v29 = vpop.f32.mrf.mxu1 }
 0x89e   : > { %v2403_v30 = vsel %vm5146_vm6, %v2401_v52, -1e+09  ;;  %v4234_v52 = vld [vmem:[%s5034_s18 + $0xec] ss:$16 sps:$4 sm:$0xff]  }
 0x89f   : > { %v2407_v31 = vsel %vm1232_vm5, %v2403_v30, -inf }
 0x8a0   : > { %2408 = vmax.xlane.f32.xlu1 %v2407_v31 }
 0x8a2   : > { %v4332_v34 = vpop.eup %4331 }
 0x8a3   : > { %v2031_v36 = vmul.f32 %v4332_v34, %v4330_v16 }
 0x8a5   : > { %4036 = vmatmul.mubr.msk.f32.vlgmr.msra.gmra.mxu0 %vm1232_vm5, %v2031_v36 }
 0x8a6   : > { %4047 = vmatprep.mubr.msk.bf16.mxu0 %vm4646_vm0, %v4645_v5  ;;  %4044 = vmatpush3.bf16.msra.mxu0 %v4225_v2 }
 0x8a7   : > { %4045 = vmatprep.subr.bf16.mxu0 %v4645_v5 }
 0x8aa   : > { %4046 = vmatpush3.bf16.msra.mxu0 %v4226_v38  ;;  %v4237_v38 = vld [vmem:[%s5034_s18 + $0xc4] ss:$16 sps:$4 sm:$0xff]  }
 0x8ab   : > { %4066 = vmatprep.subr.mxu0 %v4645_v5 }
 0x925   : > { %v2406_v11 = vpop.xlane.xlu1 %2405 }
 0x926   : > { %v2410_v39 = vsub.f32 %v2402_v24, %v2406_v11  ;;  %v4229_v24 = vld [vmem:[%s5034_s18 + $0xe0] ss:$16 sps:$4 sm:$0xff]   ;;  %v4240_v11 = vld [vmem:[%s5034_s18 + $0xcc] ss:$16 sps:$4 sm:$0xff]  }
 0x928   : > { %v2412_v43 = vmul.f32 1.442695, %v2410_v39  ;;  %v4235_v39 = vld [vmem:[%s5034_s18 + $0xc0] ss:$16 sps:$4 sm:$0xff]  }
 0x929   : > { %v2409_v47 = vpop.xlane.xlu1 %2408 }
 0x92a   : > { %4333 = vpow2.f32 %v2412_v43  ;;  %v2411_v48 = vsub.f32 %v2403_v30, %v2409_v47  ;;  %v4238_v43 = vld [vmem:[%s5034_s18 + $0xc8] ss:$16 sps:$4 sm:$0xff]   ;;  %v4243_v47 = vld [vmem:[%s5034_s18 + $0xa4] ss:$16 sps:$4 sm:$0xff]  }
 0x92c   : > { %v2414_v50 = vmul.f32 1.442695, %v2411_v48  ;;  %v4246_v48 = vld [vmem:[%s5034_s18 + $0xac] ss:$16 sps:$4 sm:$0xff]  }
 0x92e   : > { %4335 = vpow2.f32 %v2414_v50  ;;  %v4241_v50 = vld [vmem:[%s5034_s18 + $0xa0] ss:$16 sps:$4 sm:$0xff]  }
 0x937   : > { %v4334_v51 = vpop.eup %4333 }
 0x938   : > { %v2416_v53 = vsel %vm1232_vm5, %v4334_v51, 0.0 }
 0x939   : > { %2417 = vadd.xlane.f32.xlu1 %v2416_v53  ;;  %v4247_v53 = vld [vmem:[%s5034_s18 + $0x80] ss:$16 sps:$4 sm:$0xff]  }
 0x93b   : > { %v4336_v54 = vpop.eup %4335 }
 0x93c   : > { %v2419_v55 = vsel %vm1232_vm5, %v4336_v54, 0.0 }
 0x93d   : > { %2420 = vadd.xlane.f32.xlu1 %v2419_v55  ;;  %v4250_v55 = vld [vmem:[%s5034_s18 + $0x88] ss:$16 sps:$4 sm:$0xff]  }
 0x94e   : > { %2426 = vrot.lane.b32.xlu1 %v5126_v49, %s4650_s7 }
 0x965   : > { %v2105_v56 = vpop.f32.mrf.mxu0 }
 0x966   : > { %v2185_v57 = vpack.c.bf16 %v2181_v18, %v2105_v56  ;;  %v4252_v56 = vld [vmem:[%s5034_s18 + $0x8c] ss:$16 sps:$4 sm:$0xff]  }
 0x967   : > { %v4037_v58 = vpop.f32.mrf.mxu0 }
 0x968   : > { %4048 = vmatmul.mubr.msk.bf16.vlgmr.msra.gmra.mxu0 %vm1063_vm1, %v2185_v57  ;;  %v4255_v57 = vld [vmem:[%s5034_s18 + $0x64] ss:$16 sps:$4 sm:$0xff]   ;;  %v4258_v58 = vld [vmem:[%s5034_s18 + $0x6c] ss:$16 sps:$4 sm:$0xff]  }
 0x969   : > { %4067 = vmatpush3.msra.mxu0 %v2503_v59  ;;  %4068 = vmatprep.mubr.msk.f32.mxu0 %vm4646_vm0, %v4645_v5  ;;  %v4253_v59 = vld [vmem:[%s5034_s18 + $0x60] ss:$16 sps:$4 sm:$0xff]  }
 0x96a   : > { %2904 = vmatprep.subr.bf16.mxu0 %v4231_v27  ;;  %v4281_v27 = vld [vmem:[%s5036_s13 + $0x70] sm:$0xff]  }
 0x9c2   : > { %v2418_v42 = vpop.xlane.xlu1 %2417 }
 0x9c3   : > { %4337 = vrcp.f32 %v2418_v42  ;;  %v4256_v42 = vld [vmem:[%s5034_s18 + $0x68] ss:$16 sps:$4 sm:$0xff]  }
 0x9c6   : > { %v2421_v45 = vpop.xlane.xlu1 %2420 }
 0x9c7   : > { %4339 = vrcp.f32 %v2421_v45  ;;  %v4261_v45 = vld [vmem:[%s5034_s18 + $0x44] ss:$16 sps:$4 sm:$0xff]  }
 0x9ca   : > { %v2427_v62 = vpop.permute.xlu1 %2426 }
 0x9cb   : > { %4062 = vmatpush3.msra.mxu1 %v2427_v62  ;;  %v4264_v62 = vld [vmem:[%s5034_s18 + $0x4c] ss:$16 sps:$4 sm:$0xff]  }
 0x9cc   : > { %4071 = vmatprep.subr.bf16.mxu1 %v4645_v5 }
 0x9d0   : > { %v4338_v49 = vpop.eup %4337 }
 0x9d1   : > { %v2424_v63 = vmul.f32 %v4338_v49, %v4334_v51  ;;  %v4244_v51 = vld [vmem:[%s5034_s18 + $0xa8] ss:$16 sps:$4 sm:$0xff]   ;;  %v4259_v49 = vld [vmem:[%s5034_s18 + $0x40] ss:$16 sps:$4 sm:$0xff]  }
 0x9d3   : > { %4064 = vmatmul.mubr.msk.f32.vlgmr.msra.gmra.mxu1 %vm1232_vm5, %v2424_v63  ;;  %v4262_v63 = vld [vmem:[%s5034_s18 + $0x48] ss:$16 sps:$4 sm:$0xff]  }
 0x9d4   : > { %v4340_v0 = vpop.eup %4339  ;;  %4075 = vmatprep.mubr.msk.bf16.mxu1 %vm4646_vm0, %v4645_v5  ;;  %4072 = vmatpush3.bf16.msra.mxu1 %v4227_v3  ;;  %v4265_v3 = vld [vmem:[%s5034_s18 + $0x20] ss:$16 sps:$4 sm:$0xff]  }
 0x9d5   : > { %v2425_v1 = vmul.f32 %v4340_v0, %v4336_v54  ;;  %4073 = vmatprep.subr.bf16.mxu1 %v4645_v5  ;;  %v4249_v54 = vld [vmem:[%s5034_s18 + $0x84] ss:$16 sps:$4 sm:$0xff]  }
 0x9d6   : > { %v4267_v0 = vld [vmem:[%s5034_s18 + $0x24] ss:$16 sps:$4 sm:$0xff]  }
 0x9d7   : > { %4069 = vmatmul.mubr.msk.f32.vlgmr.msra.gmra.mxu0 %vm1232_vm5, %v2425_v1  ;;  %v4270_v1 = vld [vmem:[%s5034_s18 + $0x2c] ss:$16 sps:$4 sm:$0xff]  }
 0x9d8   : > { %2936 = vmatprep.mubr.bf16.mxu0 %v4644_v4  ;;  %4074 = vmatpush3.bf16.msra.mxu1 %v4228_v6  ;;  %v4268_v6 = vld [vmem:[%s5034_s18 + $0x28] ss:$16 sps:$4 sm:$0xff]  }
 0x9d9   : > { %2947 = vmatprep.subr.bf16.mxu1 %v4234_v52  ;;  %2905 = vmatpush1.bf16.msra.mxu0 %v4229_v24  ;;  %v4280_v24 = vld [vmem:[%s5036_s13 + $0xb8] sm:$0xff]   ;;  %v4283_v52 = vld [vmem:[%s5036_s13 + $0x30] sm:$0xff]  }
 0x9da   : > { %2906 = vmatprep.subr.bf16.mxu0 %v4237_v38  ;;  %v4292_v38 = vld [vmem:[%s5036_s13 + $0xa0] sm:$0xff]  }
 0x9dd   : > { %2907 = vmatpush1.bf16.msra.mxu0 %v4235_v39  ;;  %v4294_v39 = vld [vmem:[%s5036_s13 + $0xd8] sm:$0xff]  }
 0x9de   : > { %2908 = vmatprep.subr.bf16.mxu0 %v4243_v47  ;;  %v4296_v47 = vld [vmem:[%s5036_s13 + $0x98] sm:$0xff]  }
 0x9e1   : > { %2909 = vmatpush1.bf16.msra.mxu0 %v4241_v50  ;;  %v4298_v50 = vld [vmem:[%s5036_s13 + $0xd0] sm:$0xff]  }
 0x9e2   : > { %2910 = vmatprep.subr.bf16.mxu0 %v4249_v54  ;;  %v4301_v54 = vld [vmem:[%s5036_s13 + $0x48] sm:$0xff]  }
 0x9e5   : > { %2911 = vmatpush1.bf16.msra.mxu0 %v4247_v53  ;;  %v4300_v53 = vld [vmem:[%s5036_s13 + $0x90] sm:$0xff]  }
 0x9e6   : > { %2912 = vmatprep.subr.bf16.mxu0 %v4255_v57  ;;  %v4304_v57 = vld [vmem:[%s5036_s13 + $0x88] sm:$0xff]  }
 0x9e9   : > { %2913 = vmatpush1.bf16.msra.mxu0 %v4253_v59  ;;  %v4306_v59 = vld [vmem:[%s5036_s13 + $0xc0] sm:$0xff]  }
 0x9ea   : > { %2914 = vmatprep.subr.bf16.mxu0 %v4261_v45  ;;  %v4308_v45 = vld [vmem:[%s5036_s13 + $0x80] sm:$0xff]  }
 0x9ed   : > { %2915 = vmatpush1.bf16.msra.mxu0 %v4259_v49  ;;  %v2738_v49 = vsub.s32 3, %v5087_v32 }
 0x9ee   : > { %2916 = vmatprep.subr.bf16.mxu0 %v4267_v0 }
 0x9f1   : > { %2917 = vmatpush1.bf16.msra.mxu0 %v4265_v3 }
 0xa28   : > { %v2235_v8 = vpop.f32.mrf.mxu0 }
 0xa29   : > { %v2242_v44 = vadd.f32 %v2235_v8, %v1845_v7  ;;  %v4273_v7 = vld [vmem:[%s5034_s18 + $0x4] ss:$16 sps:$4 sm:$0xff]   ;;  %v4276_v8 = vld [vmem:[%s5034_s18 + $0xc] ss:$16 sps:$4 sm:$0xff]  }
 0xa2a   : > { %v4049_v9 = vpop.f32.mrf.mxu0  ;;  %2918 = vmatprep.subr.bf16.mxu0 %v4273_v7 }
 0xa2b   : > { %v4274_v9 = vld [vmem:[%s5034_s18 + $0x8] ss:$16 sps:$4 sm:$0xff]  }
 0xa2c   : > { %v2238_v12 = vpop.f32.mrf.mxu0 }
 0xa2d   : > { %v2243_v13 = vadd.f32 %v2238_v12, %v1848_v10 }
 0xa2e   : > { %v4050_v14 = vpop.f32.mrf.mxu0 }
 0xa93   : > { %v2498_v15 = vpop.f32.mrf.mxu1 }
 0xa95   : > { %v4065_v16 = vpop.f32.mrf.mxu1 }
 0xa97   : > { %v2574_v17 = vpop.f32.mrf.mxu0 }
 0xa98   : > { %v2578_v18 = vpack.c.bf16 %v2574_v17, %v2498_v15 }
 0xa99   : > { %v4070_v5 = vpop.f32.mrf.mxu0 }
 0xa9a   : > { %4076 = vmatmul.mubr.msk.bf16.vlgmr.msra.gmra.mxu1 %vm1063_vm1, %v2578_v18  ;;  %v3773_v5 = vld [vmem:[%s5563_s24] ss:$0 sm:$0xff] }
 0xa9b   : > { %2979 = vmatprep.mubr.bf16.mxu1 %v4644_v4  ;;  %2948 = vmatpush1.bf16.msra.mxu1 %v4232_v28  ;;  %v4282_v28 = vld [vmem:[%s5036_s13 + $0xf0] sm:$0xff]  }
 0xa9c   : > { %2949 = vmatprep.subr.bf16.mxu1 %v4240_v11  ;;  %v4293_v11 = vld [vmem:[%s5036_s13 + $0x58] sm:$0xff]  }
 0xa9f   : > { %2950 = vmatpush1.bf16.msra.mxu1 %v4238_v43  ;;  %v4295_v43 = vld [vmem:[%s5036_s13 + $0x18] sm:$0xff]  }
 0xaa0   : > { %2951 = vmatprep.subr.bf16.mxu1 %v4246_v48  ;;  %v4297_v48 = vld [vmem:[%s5036_s13 + $0x50] sm:$0xff]  }
 0xaa3   : > { %2952 = vmatpush1.bf16.msra.mxu1 %v4244_v51  ;;  %v4299_v51 = vld [vmem:[%s5036_s13 + $0x10] sm:$0xff]  }
 0xaa4   : > { %2953 = vmatprep.subr.bf16.mxu1 %v4252_v56  ;;  %v4303_v56 = vld [vmem:[%s5036_s13 + $0x8] sm:$0xff]  }
 0xaa7   : > { %2954 = vmatpush1.bf16.msra.mxu1 %v4250_v55  ;;  %v4302_v55 = vld [vmem:[%s5036_s13 + $0xc8] sm:$0xff]  }
 0xaa8   : > { %2955 = vmatprep.subr.bf16.mxu1 %v4258_v58  ;;  %v4305_v58 = vld [vmem:[%s5036_s13 + $0x40] sm:$0xff]  }
 0xaab   : > { %2956 = vmatpush1.bf16.msra.mxu1 %v4256_v42  ;;  %v4307_v42 = vld [vmem:[%s5036_s13] sm:$0xff]  }
 0xaac   : > { %2957 = vmatprep.subr.bf16.mxu1 %v4264_v62  ;;  %v2722_v62 = vld [vmem:[%s5016_s11] sm:$0xf] }
 0xaad   : > { %v2735_v0 = vrot.slane %v2722_v62, %v830_v46  ;;  %v2739_v3 = vrot.slane %v2722_v62, %v2738_v49 }
 0xaaf   : > { %2958 = vmatpush1.bf16.msra.mxu1 %v4262_v63  ;;  %v2727_v63 = vrot.slane %v2722_v62, %v5092_v35 }
 0xab0   : > { %2959 = vmatprep.subr.bf16.mxu1 %v4270_v1  ;;  %v2731_v1 = vrot.slane %v2722_v62, %v826_v33 }
 0xab3   : > { %2960 = vmatpush1.bf16.msra.mxu1 %v4268_v6 }
 0xab4   : > { %2961 = vmatprep.subr.bf16.mxu1 %v4276_v8 }
 0xab7   : > { %2962 = vmatpush1.bf16.msra.mxu1 %v4274_v9 }
 0xb5a   : > { %v2628_v37 = vpop.f32.mrf.mxu1 }
 0xb5b   : > { %v2635_v60 = vadd.f32 %v2628_v37, %v2242_v44  ;;  %v4271_v44 = vld [vmem:[%s5034_s18] ss:$16 sps:$4 sm:$0xff]  }
 0xb5c   : > { %v4077_v61 = vpop.f32.mrf.mxu1  ;;  %2919 = vmatpush1.bf16.msra.mxu0 %v4271_v44 }
 0xb5d   : > { %v2644_v19 = vadd.f32 %v3772_v41, %v2635_v60  ;;  %v3774_v61 = vld [vmem:[%s732_s19] ss:$0 sm:$0xff] }
 0xb5e   : > { %v2631_v20 = vpop.f32.mrf.mxu1 }
 0xb5f   : > { %v2636_v21 = vadd.f32 %v2631_v20, %v2243_v13  ;;  %v2646_v40 = vadd.f32 %v2644_v19, %v5066_v25 }
 0xb60   : > { %v4078_v22 = vpop.f32.mrf.mxu1 }
 0xb61   : > { %v2645_v23 = vadd.f32 %v3772_v41, %v2636_v21  ;;  %2650 = vadd.xlane.f32.xlu0 %v2646_v40  ;;  %v4277_v22 = vld [vmem:[%s5036_s13 + $0x78] sm:$0xff]  }
 0xb62   : > { %3903 = vmatprep.subr.bf16.mxu0 %v4277_v22 }
 0xb63   : > { %v2647_v4 = vadd.f32 %v2645_v23, %v5068_v26  ;;  %v4278_v23 = vld [vmem:[%s5036_s13 + $0xf8] sm:$0xff]  }
 0xb64   : > { %3925 = vmatprep.subr.bf16.mxu1 %v4278_v23 }
 0xb65   : > { %2652 = vadd.xlane.f32.xlu1 %v2647_v4 }
 0xbea   : > { %v2651_v29 = vpop.xlane.xlu0 %2650 }
 0xbeb   : > { %v2655_v25 = vmul.f32 0.0078125, %v2651_v29  ;;  %v4284_v29 = vld [vmem:[%s5036_s13 + $0xb0] sm:$0xff]  }
 0xbed   : > { %v5327_v30 = vsub.f32 %v2646_v40, %v2655_v25  ;;  %v4285_v25 = vld [vmem:[%s5036_s13 + $0x68] sm:$0xff]  }
 0xbee   : > { %v2653_v31 = vpop.xlane.xlu1 %2652 }
 0xbef   : > { %v2656_v26 = vmul.f32 0.0078125, %v2653_v31  ;;  %v2659_v34 = vmul.f32 %v5327_v30, %v5327_v30  ;;  %v4287_v31 = vld [vmem:[%s5036_s13 + $0x28] sm:$0xff]  }
 0xbf1   : > { %v5331_v36 = vsub.f32 %v2647_v4, %v2656_v26  ;;  %2661 = vadd.xlane.f32.xlu0 %v2659_v34  ;;  %v4279_v4 = vld [vmem:[%s5036_s13 + $0x38] sm:$0xff]   ;;  %v4288_v26 = vld [vmem:[%s5036_s13 + $0xa8] sm:$0xff]   ;;  %v4289_v34 = vld [vmem:[%s5036_s13 + $0x60] sm:$0xff]  }
 0xbf3   : > { %v2660_v2 = vmul.f32 %v5331_v36, %v5331_v36 }
 0xbf5   : > { %2663 = vadd.xlane.f32.xlu0 %v2660_v2  ;;  %v4291_v2 = vld [vmem:[%s5036_s13 + $0x20] sm:$0xff]  }
 0xc7a   : > { %v2662_v10 = vpop.xlane.xlu0 %2661 }
 0xc7b   : > { %v2665_v12 = vmul.f32 0.0078125, %v2662_v10 }
 0xc7d   : > { %v2667_v13 = vadd.f32 1e-05, %v2665_v12 }
 0xc7e   : > { %v2664_v14 = vpop.xlane.xlu0 %2663 }
 0xc7f   : > { %4341 = vrsqrt.f32 %v2667_v13  ;;  %v2666_v15 = vmul.f32 0.0078125, %v2664_v14 }
 0xc81   : > { %v2668_v16 = vadd.f32 1e-05, %v2666_v15 }
 0xc83   : > { %4343 = vrsqrt.f32 %v2668_v16 }
 0xc8c   : > { %v4342_v17 = vpop.eup %4341 }
 0xc8d   : > { %v2671_v18 = vmul.f32 %v4342_v17, %v5327_v30  ;;  %v4286_v30 = vld [vmem:[%s5036_s13 + $0xe8] sm:$0xff]  }
 0xc8f   : > { %v2679_v60 = vmul.f32 %v3773_v5, %v2671_v18 }
 0xc90   : > { %v4344_v37 = vpop.eup %4343 }
 0xc91   : > { %v2672_v41 = vmul.f32 %v4344_v37, %v5331_v36  ;;  %v5375_v20 = vadd.f32 %v3774_v61, %v2679_v60  ;;  %v4290_v36 = vld [vmem:[%s5036_s13 + $0xe0] sm:$0xff]  }
 0xc93   : > { %v2680_v19 = vmul.f32 %v3773_v5, %v2672_v41 }
 0xc95   : > { %v5377_v21 = vadd.f32 %v3774_v61, %v2680_v19 }
 0xc97   : > { %v2689_v40 = vpack.c.bf16 %v5377_v21, %v5375_v20 }
 0xc99   : > { %2937 = vmatmul.mubr.bf16.vlgmr.msra.gmra.mxu0 %v2689_v40  ;;  %2980 = vmatmul.mubr.bf16.vlgmr.msra.gmra.mxu1 %v2689_v40 }
 0xc9a   : > { %3904 = vmatpush3.bf16.msra.mxu0 %v4279_v4  ;;  %3926 = vmatpush3.bf16.msra.mxu1 %v4280_v24 }
 0xc9b   : > { %3905 = vmatprep.subr.bf16.mxu0 %v4281_v27  ;;  %3927 = vmatprep.subr.bf16.mxu1 %v4282_v28 }
 0xc9e   : > { %3906 = vmatpush3.bf16.msra.mxu0 %v4283_v52  ;;  %3928 = vmatpush3.bf16.msra.mxu1 %v4284_v29 }
 0xc9f   : > { %3907 = vmatprep.subr.bf16.mxu0 %v4285_v25  ;;  %3929 = vmatprep.subr.bf16.mxu1 %v4286_v30 }
 0xca2   : > { %3908 = vmatpush3.bf16.msra.mxu0 %v4287_v31  ;;  %3930 = vmatpush3.bf16.msra.mxu1 %v4288_v26 }
 0xca3   : > { %3909 = vmatprep.subr.bf16.mxu0 %v4289_v34  ;;  %3931 = vmatprep.subr.bf16.mxu1 %v4290_v36 }
 0xca6   : > { %3910 = vmatpush3.bf16.msra.mxu0 %v4291_v2  ;;  %3932 = vmatpush3.bf16.msra.mxu1 %v4292_v38 }
 0xca7   : > { %3911 = vmatprep.subr.bf16.mxu0 %v4293_v11  ;;  %3933 = vmatprep.subr.bf16.mxu1 %v4294_v39 }
 0xcaa   : > { %3912 = vmatpush3.bf16.msra.mxu0 %v4295_v43  ;;  %3934 = vmatpush3.bf16.msra.mxu1 %v4296_v47 }
 0xcab   : > { %3913 = vmatprep.subr.bf16.mxu0 %v4297_v48  ;;  %3935 = vmatprep.subr.bf16.mxu1 %v4298_v50 }
 0xcae   : > { %3914 = vmatpush3.bf16.msra.mxu0 %v4299_v51  ;;  %3936 = vmatpush3.bf16.msra.mxu1 %v4300_v53 }
 0xcaf   : > { %3915 = vmatprep.subr.bf16.mxu0 %v4301_v54  ;;  %3937 = vmatprep.subr.bf16.mxu1 %v4302_v55 }
 0xcb2   : > { %3916 = vmatpush3.bf16.msra.mxu0 %v4303_v56  ;;  %3938 = vmatpush3.bf16.msra.mxu1 %v4304_v57 }
 0xcb3   : > { %3917 = vmatprep.subr.bf16.mxu0 %v4305_v58  ;;  %3939 = vmatprep.subr.bf16.mxu1 %v4306_v59 }
 0xcb6   : > { %3918 = vmatpush3.bf16.msra.mxu0 %v4307_v42  ;;  %3940 = vmatpush3.bf16.msra.mxu1 %v4308_v45 }
 0xd59   : > { %v2938_v6 = vpop.f32.mrf.mxu0  ;;  %v2981_v7 = vpop.f32.mrf.mxu1 }
 0xd5a   : > { %v5420_v8 = vadd.f32 %v2938_v6, %v2727_v63  ;;  %v5422_v44 = vadd.f32 %v2981_v7, %v2735_v0 }
 0xd5b   : > { %v2940_v9 = vpop.f32.mrf.mxu0  ;;  %v2983_v10 = vpop.f32.mrf.mxu1 }
 0xd5c   : > { %v2998_v12 = vmul.f32 0.044715, %v5420_v8  ;;  %v3000_v13 = vmul.f32 0.044715, %v5422_v44  ;;  %v2941_v35 = vadd.f32 %v2940_v9, %v2731_v1  ;;  %v5426_v14 = vadd.f32 %v2983_v10, %v2739_v3 }
 0xd5d   : > { %v2942_v46 = vpop.f32.mrf.mxu0  ;;  %v2985_v15 = vpop.f32.mrf.mxu1  ;;  %v2990_v9 = vmul.f32 0.5, %v5420_v8 }
 0xd5e   : > { %v3006_v32 = vmul.f32 %v2998_v12, %v5420_v8  ;;  %v3008_v33 = vmul.f32 %v3000_v13, %v5422_v44  ;;  %v2999_v16 = vmul.f32 0.044715, %v2941_v35  ;;  %v3001_v17 = vmul.f32 0.044715, %v5426_v14 }
 0xd5f   : > { %v2943_v18 = vadd.f32 %v2942_v46, %v2727_v63  ;;  %v5431_v5 = vadd.f32 %v2985_v15, %v2735_v0  ;;  %v2944_v37 = vpop.f32.mrf.mxu0  ;;  %v2987_v41 = vpop.f32.mrf.mxu1  ;;  %v2991_v6 = vmul.f32 0.5, %v2941_v35 }
 0xd60   : > { %v3014_v60 = vmul.f32 %v3006_v32, %v5420_v8  ;;  %v3016_v61 = vmul.f32 %v3008_v33, %v5422_v44  ;;  %v3007_v19 = vmul.f32 %v2999_v16, %v2941_v35  ;;  %v3009_v40 = vmul.f32 %v3001_v17, %v5426_v14 }
 0xd61   : > { %v3002_v22 = vmul.f32 0.044715, %v2943_v18  ;;  %v3004_v23 = vmul.f32 0.044715, %v5431_v5  ;;  %v2945_v4 = vadd.f32 %v2944_v37, %v2731_v1  ;;  %v2988_v24 = vadd.f32 %v2987_v41, %v2739_v3 }
 0xd62   : > { %v3022_v27 = vadd.f32 %v3014_v60, %v5420_v8  ;;  %v3024_v28 = vadd.f32 %v3016_v61, %v5422_v44  ;;  %v3015_v52 = vmul.f32 %v3007_v19, %v2941_v35  ;;  %v3017_v29 = vmul.f32 %v3009_v40, %v5426_v14 }
 0xd63   : > { %v3010_v25 = vmul.f32 %v3002_v22, %v2943_v18  ;;  %v3012_v30 = vmul.f32 %v3004_v23, %v5431_v5  ;;  %v3003_v31 = vmul.f32 0.044715, %v2945_v4  ;;  %v3005_v26 = vmul.f32 0.044715, %v2988_v24 }
 0xd64   : > { %v3030_v34 = vmul.f32 0.7978846, %v3022_v27  ;;  %v3032_v36 = vmul.f32 0.7978846, %v3024_v28  ;;  %v3023_v2 = vadd.f32 %v3015_v52, %v2941_v35  ;;  %v3025_v48 = vadd.f32 %v3017_v29, %v5426_v14 }
 0xd65   : > { %v3018_v38 = vmul.f32 %v3010_v25, %v2943_v18  ;;  %v3020_v11 = vmul.f32 %v3012_v30, %v5431_v5  ;;  %v3011_v39 = vmul.f32 %v3003_v31, %v2945_v4  ;;  %v3013_v43 = vmul.f32 %v3005_v26, %v2988_v24 }
 0xd66   : > { %v3031_v47 = vmul.f32 0.7978846, %v3023_v2  ;;  %4345 = vtanh.f32 %v3030_v34  ;;  %v3033_v55 = vmul.f32 0.7978846, %v3025_v48  ;;  %v2994_v46 = vmul.f32 0.5, %v2943_v18 }
 0xd67   : > { %v3026_v50 = vadd.f32 %v3018_v38, %v2943_v18  ;;  %v3028_v51 = vadd.f32 %v3020_v11, %v5431_v5  ;;  %v3019_v53 = vmul.f32 %v3011_v39, %v2945_v4  ;;  %4347 = vtanh.f32 %v3032_v36 }
 0xd68   : > { %v3021_v54 = vmul.f32 %v3013_v43, %v2988_v24  ;;  %4349 = vtanh.f32 %v3031_v47  ;;  %v2995_v16 = vmul.f32 0.5, %v2945_v4  ;;  %v2996_v37 = vmul.f32 0.5, %v5431_v5 }
 0xd69   : > { %v3034_v56 = vmul.f32 0.7978846, %v3026_v50  ;;  %v3036_v57 = vmul.f32 0.7978846, %v3028_v51  ;;  %v3027_v58 = vadd.f32 %v3019_v53, %v2945_v4  ;;  %4351 = vtanh.f32 %v3033_v55 }
 0xd6a   : > { %v3029_v59 = vadd.f32 %v3021_v54, %v2988_v24  ;;  %v2993_v60 = vmul.f32 0.5, %v5426_v14  ;;  %v2997_v61 = vmul.f32 0.5, %v2988_v24  ;;  %v2992_v8 = vmul.f32 0.5, %v5422_v44  ;;  %v3807_v44 = vld [vmem:[%s739_s12] ss:$0 sm:$0xff] }
 0xd6b   : > { %4353 = vtanh.f32 %v3034_v56  ;;  %v3035_v42 = vmul.f32 0.7978846, %v3027_v58 }
 0xd6c   : > { %4355 = vtanh.f32 %v3036_v57  ;;  %v3037_v45 = vmul.f32 0.7978846, %v3029_v59 }
 0xd6d   : > { %4357 = vtanh.f32 %v3035_v42 }
 0xd6e   : > { %4359 = vtanh.f32 %v3037_v45 }
 0xd73   : > { %v4346_v62 = vpop.eup %4345 }
 0xd74   : > { %v4348_v49 = vpop.eup %4347  ;;  %v3046_v15 = vadd.f32 1.0, %v4346_v62 }
 0xd75   : > { %v4350_v63 = vpop.eup %4349  ;;  %v3048_v41 = vadd.f32 1.0, %v4348_v49 }
 0xd76   : > { %v4352_v0 = vpop.eup %4351  ;;  %v3047_v7 = vadd.f32 1.0, %v4350_v63  ;;  %v3054_v28 = vmul.f32 %v3046_v15, %v2990_v9  ;;  %v3841_v9 = vld [vmem:[%s745_s2] ss:$0 sm:$0xff] }
 0xd77   : > { %v3049_v13 = vadd.f32 1.0, %v4352_v0  ;;  %v3056_v4 = vmul.f32 %v3048_v41, %v2992_v8 }
 0xd78   : > { %v4354_v1 = vpop.eup %4353  ;;  %v3055_v40 = vmul.f32 %v3047_v7, %v2991_v6  ;;  %v3840_v6 = vld [vmem:[%s742_s3] ss:$0 sm:$0xff] }
 0xd79   : > { %v4356_v3 = vpop.eup %4355  ;;  %v3050_v10 = vadd.f32 1.0, %v4354_v1  ;;  %v3057_v18 = vmul.f32 %v3049_v13, %v2993_v60 }
 0xd7a   : > { %v4358_v12 = vpop.eup %4357  ;;  %v3052_v32 = vadd.f32 1.0, %v4356_v3 }
 0xd7b   : > { %v4360_v33 = vpop.eup %4359  ;;  %v3051_v17 = vadd.f32 1.0, %v4358_v12  ;;  %v3058_v35 = vmul.f32 %v3050_v10, %v2994_v46 }
 0xd7c   : > { %v3053_v19 = vadd.f32 1.0, %v4360_v33  ;;  %v3060_v23 = vmul.f32 %v3052_v32, %v2996_v37 }
 0xd7d   : > { %v3059_v22 = vmul.f32 %v3051_v17, %v2995_v16  ;;  %v3062_v25 = vpack.c.bf16 %v3058_v35, %v3054_v28 }
 0xd7e   : > { %v3061_v27 = vmul.f32 %v3053_v19, %v2997_v61  ;;  %v3064_v5 = vpack.c.bf16 %v3060_v23, %v3056_v4 }
 0xd7f   : > { %v3063_v52 = vpack.c.bf16 %v3059_v22, %v3055_v40 }
 0xd80   : > { %v3065_v29 = vpack.c.bf16 %v3061_v27, %v3057_v18 }
 0xd81   : > { %3361 = vmatprep.mubr.bf16.mxu0 %v3063_v52 }
 0xd82   : > { %3402 = vmatprep.mubr.bf16.mxu1 %v3065_v29  ;;  %3362 = vmatmul.mubr.bf16.vlgmr.msra.gmra.mxu0 %v3062_v25 }
 0xd83   : > { %3403 = vmatmul.mubr.bf16.vlgmr.msra.gmra.mxu1 %v3064_v5 }
 0xe42   : > { %v3919_v14 = vpop.f32.mrf.mxu0 }
 0xe43   : > { %v3941_v24 = vpop.f32.mrf.mxu1 }
 0xe44   : > { %v3920_v30 = vpop.f32.mrf.mxu0 }
 0xe45   : > { %v3921_v31 = vadd.f32 %v3920_v30, %v3919_v14  ;;  %v3942_v26 = vpop.f32.mrf.mxu1 }
 0xe46   : > { %v3922_v34 = vpop.f32.mrf.mxu0  ;;  %v3943_v2 = vadd.f32 %v3942_v26, %v3941_v24 }
 0xe47   : > { %v3364_v36 = vadd.f32 %v3921_v31, %v3807_v44  ;;  %v3944_v38 = vpop.f32.mrf.mxu1 }
 0xe48   : > { %v3923_v11 = vpop.f32.mrf.mxu0 }
 0xe49   : > { %v3405_v39 = vadd.f32 %v3943_v2, %v3364_v36  ;;  %v3924_v43 = vadd.f32 %v3923_v11, %v3922_v34  ;;  %v3945_v47 = vpop.f32.mrf.mxu1 }
 0xe4a   : > { %v3946_v50 = vadd.f32 %v3945_v47, %v3944_v38 }
 0xe4b   : > { %v3367_v48 = vadd.f32 %v3924_v43, %v3807_v44  ;;  %v3411_v51 = vadd.f32 %v3405_v39, %v5375_v20 }
 0xe4d   : > { %v3408_v53 = vadd.f32 %v3946_v50, %v3367_v48  ;;  %3415 = vadd.xlane.f32.xlu0 %v3411_v51 }
 0xe4f   : > { %v3412_v54 = vadd.f32 %v3408_v53, %v5377_v21 }
 0xe51   : > { %3417 = vadd.xlane.f32.xlu0 %v3412_v54 }
 0xed6   : > { %v3416_v55 = vpop.xlane.xlu0 %3415 }
 0xed7   : > { %v3419_v56 = vmul.f32 0.0078125, %v3416_v55 }
 0xed9   : > { %v3421_v57 = vsub.f32 %v3411_v51, %v3419_v56 }
 0xeda   : > { %v3418_v58 = vpop.xlane.xlu0 %3417 }
 0xedb   : > { %v3420_v59 = vmul.f32 0.0078125, %v3418_v58  ;;  %v3423_v42 = vmul.f32 %v3421_v57, %v3421_v57 }
 0xedd   : > { %v3422_v45 = vsub.f32 %v3412_v54, %v3420_v59  ;;  %3425 = vadd.xlane.f32.xlu0 %v3423_v42 }
 0xedf   : > { %v3424_v62 = vmul.f32 %v3422_v45, %v3422_v45 }
 0xee1   : > { %3427 = vadd.xlane.f32.xlu1 %v3424_v62 }
 0xf66   : > { %v3426_v49 = vpop.xlane.xlu0 %3425 }
 0xf67   : > { %v3429_v63 = vmul.f32 0.0078125, %v3426_v49 }
 0xf69   : > { %v3431_v20 = vadd.f32 1e-05, %v3429_v63 }
 0xf6a   : > { %v3428_v0 = vpop.xlane.xlu1 %3427 }
 0xf6b   : > { %4361 = vrsqrt.f32 %v3431_v20  ;;  %v3430_v1 = vmul.f32 0.0078125, %v3428_v0 }
 0xf6d   : > { %v3432_v21 = vadd.f32 1e-05, %v3430_v1 }
 0xf6f   : > { %4363 = vrsqrt.f32 %v3432_v21 }
 0xf78   : > { %v4362_v3 = vpop.eup %4361 }
 0xf79   : > { %v3435_v7 = vmul.f32 %v4362_v3, %v3421_v57 }
 0xf7b   : > { %v3443_v10 = vmul.f32 %v3840_v6, %v3435_v7 }
 0xf7c   : > { %v4364_v12 = vpop.eup %4363 }
 0xf7d   : > { %v3451_v13 = vadd.f32 %v3841_v9, %v3443_v10  ;;  %v3436_v46 = vmul.f32 %v4364_v12, %v3422_v45 }
 0xf7f   : > { %3453 = vst [vmem:[#allocation2] sm:$0xff] %v3451_v13  ;;  %v3444_v15 = vmul.f32 %v3840_v6, %v3436_v46  ;;  %3458 = sbr.rel (%p3842_p9) target bundleno = 3980 (0xf8c), region = 112 }
 0xf81   : > { %v3452_v32 = vadd.f32 %v3841_v9, %v3444_v15 }
 0xf83   : > { %3454 = vst [vmem:[#allocation2 + $0x8] sm:$0xff] %v3452_v32 }
 0xf86   : > { %v3459_v33 = vld [vmem:[#allocation2] sm:$0xff] }
 0xf87   : > { %3461 = vst [vmem:[#allocation13] sm:$0xff] %v3459_v33 }
 0xf8a   : > { %v3460_v16 = vld [vmem:[#allocation2 + $0x8] sm:$0xff] }
 0xf8b   : > { %3462 = vst [vmem:[#allocation13 + $0x8] sm:$0xff] %v3460_v16 }
 0xf8c PF: > { %p4135_p8 = scmp.eq.s32.totalorder %s4748_s17, 1  ;;  %s4651_s3 = smov [#allocation13]  }
 0xf8d   : > { %s3469_s14 = sshll.u32 %s4651_s3, 4  ;;  %s3470_s14 = int_to_ptr.vmem [resolvable:$true] %s3469_s14 }
 0xf8e   : > { %s4557_s2 = scalar_lea.vmem %s3470_s14, 256  ;;  %p4564_p12 = scmp.lt.s32.totalorder %s3470_s14, %s3470_s14 }
 0xf8f   : > { %p4558_p10 = scmp.ne.s32.totalorder %s3470_s14, %s4557_s2  ;;  %p4565_p5 = scmp.lt.s32.totalorder %s4557_s2, %s4557_s2 }
 0xf91   : > { %p4559_p13 = pnand %p4558_p10, %p4135_p8  ;;  %p4566_p2 = por %p4565_p5, %p4564_p12 }
 0xf93   : > { %p4560_p1 = pneg %p4559_p13 }
 0xf95   : > { %p4567_p3 = pnand %p4566_p2, %p4560_p1 }
 0xf97   : > { %4570 = shalt.err (!%p4567_p3)
}
 0xf98   : > { %s4652_s1 = smov 128   ;;  %s4653_s6 = smov 8  }
 0xf99   : > { %s5568_s0 = sld [smem:[#allocation32_spill]] }
 0xf9f   : > { %4104 = dma.vmem_to_hbm [thread:$0]  (%p4135_p8), %s3470_s14, 256, %s5568_s0, [#allocation5], %s4652_s1, %s4652_s1, %s4653_s6  }
 0xfa0   : > { %4610 = dma.done.wait (%p4135_p8), [#allocation5], 256  }
 0xfa1   : > { %4612 = vsyncadd (%p4135_p8), [#allocation5], 4294967040 }
 0xfa2 PF: > { %s5569_s16 = sld [smem:[#allocation19_spill]]  ;;  %s5572_s29 = smov %s4619_s30 }
 0xfa3   : > { %s5570_s23 = sld [smem:[#allocation18_spill]] }
 0xfa4   : > { %s5571_s15 = sld [smem:[#allocation20_spill]] }
 0xfa8   : > { %p24_p6 = scmp.ge.s32.totalorder %s5569_s16, 4  }
 0xfa9   : > { %s5573_s30 = smov %s5570_s23 }
 0xfaa   :  { %26 = sbr.rel (!%p24_p6) target bundleno = 17 (0x11), region = 193 }
 0xfaf   :  { %3485 = vsyncpa [#allocation4], 1 }
 0xfb0   :  { %3487 = vsyncpa [#allocation4 + $0x1], 1 }
 0xfb1   :  { %3488 = vsyncpa [#allocation7], 1 }
 0xfb2   :  { %3489 = vsyncpa [#allocation5], 1 }
 0xfb3   :  { %3491 = vsyncpa [#allocation5 + $0x1], 1 }

</bundles_post_ra>
